<compile_context>
chip_gen: v7x
topology: tpu7x:2x2x1
jax: 0.10.0
libtpu: 0.0.40
codegen_flags: <defaults>
</compile_context>

<pallas_src>
import functools

import jax
import jax.numpy as jnp
from jax import lax
from jax.experimental import pallas as pl
from jax.experimental.pallas import tpu as pltpu


def _round_up(x, m):
    return (x + m - 1) // m * m


def _conv_relu_pool_kernel(x_ref, w_ref, b_ref, o_ref, xpad_ref, y_ref, *,
                           H, W, Cin, Cpad):
    """One batch element per grid step.

    x_ref:   (1, H, W, Cin)     unpadded NHWC input tile
    w_ref:   (9*Cin, Cpad)      conv weights, row = (kh*3 + kw)*Cin + ci,
                                channel (lane) dim zero-padded to Cpad
    b_ref:   (1, Cpad)          zero-padded bias
    o_ref:   (1, Hp*Wp, Cpad)   pooled output (lane-dense), row = hp*Wp + wp
    xpad_ref: VMEM (H+2, W+2, Cin) scratch, zero-padded input tile
    y_ref:    VMEM (H, W, Cpad)    scratch, conv+ReLU result
    """
    Hp, Wp = H // 2, W // 2

    # --- in-kernel zero padding (no padded-activation round trip via HBM) ---
    xpad_ref[...] = jnp.zeros((H + 2, W + 2, Cin), jnp.float32)
    xpad_ref[1:H + 1, 1:W + 1, :] = x_ref[0]

    # --- 3x3 conv on the MXU: 9 matmuls (H*W, Cin) x (Cin, Cpad), f32 acc ---
    # (For larger Cin, concatenate the 9 slabs into a single (H*W, 9*Cin)
    #  im2col matrix and emit one matmul.)
    w_all = w_ref[...]                                   # (9*Cin, Cpad)
    acc = jnp.zeros((H * W, Cpad), jnp.float32)
    for kh in range(3):
        for kw in range(3):
            slab = xpad_ref[kh:kh + H, kw:kw + W, :].reshape(H * W, Cin)
            k = kh * 3 + kw
            wk = w_all[k * Cin:(k + 1) * Cin, :]         # (Cin, Cpad)
            acc = acc + jnp.dot(slab, wk, preferred_element_type=jnp.float32)

    # --- bias + ReLU (lane-dense layout) ---
    y = jnp.maximum(acc + b_ref[...], 0.0)               # (H*W, Cpad)
    y_ref[...] = y.reshape(H, W, Cpad)

    # --- 2x2 / stride-2 max pool, vectorized, single dense store ---
    w_even = y_ref[:, pl.ds(0, Wp, stride=2), :]         # (H, Wp, Cpad)
    w_odd = y_ref[:, pl.ds(1, Wp, stride=2), :]          # (H, Wp, Cpad)
    wmax = jnp.maximum(w_even, w_odd)                    # W-pooled
    hpair = wmax.reshape(Hp, 2, Wp, Cpad)                # H pairs on a leading dim
    pooled = jnp.maximum(hpair[:, 0], hpair[:, 1])       # (Hp, Wp, Cpad)
    o_ref[0] = pooled.reshape(Hp * Wp, Cpad)             # one dense store


def conv_relu_pool(x_nchw, weight, bias):
    """Forward of MySubmodule2. x_nchw: (N, Cin, H, W); weight: (Cout, Cin, 3, 3)."""
    N, Cin, H, W = x_nchw.shape
    Cout = weight.shape[0]
    assert H % 2 == 0 and W % 2 == 0, "MaxPool2d(2,2) path assumes even H, W"
    Hp, Wp = H // 2, W // 2
    Cpad = max(128, _round_up(Cout, 128))   # lane-dense channel dim

    # Glue: NCHW -> NHWC (no spatial padding here; done in-kernel).
    x = jnp.transpose(x_nchw, (0, 2, 3, 1)).astype(jnp.float32)
    # (Cout, Cin, 3, 3) -> (kh, kw, ci, co) -> (9*Cin, Cout), zero-pad lanes to Cpad.
    w2d = jnp.transpose(weight, (2, 3, 1, 0)).reshape(9 * Cin, Cout).astype(jnp.float32)
    w2d = jnp.pad(w2d, ((0, 0), (0, Cpad - Cout)))
    b2d = jnp.pad(bias.reshape(1, Cout).astype(jnp.float32), ((0, 0), (0, Cpad - Cout)))

    kernel = functools.partial(_conv_relu_pool_kernel, H=H, W=W, Cin=Cin, Cpad=Cpad)
    out_flat = pl.pallas_call(
        kernel,
        out_shape=jax.ShapeDtypeStruct((N, Hp * Wp, Cpad), jnp.float32),
        grid_spec=pltpu.PrefetchScalarGridSpec(
            num_scalar_prefetch=0,
            grid=(N,),                      # N>=2 parallel steps keeps both v7x TCs busy
            in_specs=[
                pl.BlockSpec((1, H, W, Cin), lambda n: (n, 0, 0, 0)),
                pl.BlockSpec((9 * Cin, Cpad), lambda n: (0, 0)),
                pl.BlockSpec((1, Cpad), lambda n: (0, 0)),
            ],
            out_specs=pl.BlockSpec((1, Hp * Wp, Cpad), lambda n: (n, 0, 0)),
            scratch_shapes=[
                pltpu.VMEM((H + 2, W + 2, Cin), jnp.float32),
                pltpu.VMEM((H, W, Cpad), jnp.float32),
            ],
        ),
        compiler_params=pltpu.CompilerParams(
            dimension_semantics=("parallel",)),
    )(x, w2d, b2d)

    # (N, Hp*Wp, Cpad) -> (N, Hp, Wp, Cout) -> back to PyTorch NCHW convention.
    out = out_flat.reshape(N, Hp, Wp, Cpad)[:, :, :, :Cout]
    return jnp.transpose(out, (0, 3, 1, 2))


def _reference(x_nchw, weight, bias):
    conv = lax.conv_general_dilated(
        x_nchw, weight, window_strides=(1, 1), padding=((1, 1), (1, 1)),
        dimension_numbers=("NCHW", "OIHW", "NCHW"))
    y = jnp.maximum(conv + bias[None, :, None, None], 0.0)
    return lax.reduce_window(y, -jnp.inf, lax.max,
                             (1, 1, 2, 2), (1, 1, 2, 2), "VALID")


if __name__ == "__main__":
    N, Cin, Cout, H, W = 2, 4, 8, 16, 16

    key = jax.random.PRNGKey(0)
    k_x, k_w, k_b = jax.random.split(key, 3)
    x = jax.random.normal(k_x, (N, Cin, H, W), dtype=jnp.float32)
    # Deterministic synthetic Conv2d parameters (same shapes as nn.Conv2d).
    weight = 0.1 * jax.random.normal(k_w, (Cout, Cin, 3, 3), dtype=jnp.float32)
    bias = 0.1 * jax.random.normal(k_b, (Cout,), dtype=jnp.float32)

    out = conv_relu_pool(x, weight, bias)
    out = jax.block_until_ready(out)

    ref = _reference(x, weight, bias)
    assert out.shape == (N, Cout, H // 2, W // 2), out.shape
    assert jnp.allclose(out, ref, atol=1e-4, rtol=1e-4), "mismatch vs reference"

    print("KERNEL_OK")
</pallas_src>

<mosaic_0001>
module attributes {stable_mosaic.version = 11 : i64} {
  func.func @_conv_relu_pool_kernel(%arg0: i32, %arg1: memref<1x16x16x4xf32, #tpu.memory_space<vmem>>, %arg2: memref<36x128xf32, #tpu.memory_space<vmem>>, %arg3: memref<1x128xf32, #tpu.memory_space<vmem>>, %arg4: memref<1x64x128xf32, #tpu.memory_space<vmem>>, %arg5: memref<18x18x4xf32, #tpu.memory_space<vmem>>, %arg6: memref<16x16x128xf32, #tpu.memory_space<vmem>>) attributes {dimension_semantics = [#tpu.dimension_semantics<parallel>], iteration_bounds = array<i64: 2>, scalar_prefetch = 0 : i64, scratch_operands = 2 : i64, tpu.core_type = #tpu.core_type<tc>, window_params = [{transform_indices = @transform_0, window_bounds = array<i64: 1, 16, 16, 4>}, {pipeline_mode = #tpu.pipeline_mode<synchronous>, transform_indices = @transform_1, window_bounds = array<i64: 36, 128>}, {pipeline_mode = #tpu.pipeline_mode<synchronous>, transform_indices = @transform_2, window_bounds = array<i64: 1, 128>}, {transform_indices = @transform_3, window_bounds = array<i64: 1, 64, 128>}]} {
    %cst = arith.constant 0.000000e+00 : f32
    %0 = vector.broadcast %cst : f32 to vector<18x18x4xf32>
    %c0 = arith.constant 0 : index
    %c0_0 = arith.constant 0 : index
    %c0_1 = arith.constant 0 : index
    %1 = vector.load %arg5[%c0, %c0_0, %c0_1] : memref<18x18x4xf32, #tpu.memory_space<vmem>>, vector<18x18x4xf32>
    tpu.vector_store %arg5[%c0, %c0_0, %c0_1], %0 {strides = array<i32>} : memref<18x18x4xf32, #tpu.memory_space<vmem>>, vector<18x18x4xf32>,
    %c0_2 = arith.constant 0 : index
    %c0_3 = arith.constant 0 : index
    %c0_4 = arith.constant 0 : index
    %c0_5 = arith.constant 0 : index
    %2 = vector.load %arg1[%c0_2, %c0_3, %c0_4, %c0_5] : memref<1x16x16x4xf32, #tpu.memory_space<vmem>>, vector<1x16x16x4xf32>
    %3 = vector.shape_cast %2 : vector<1x16x16x4xf32> to vector<16x16x4xf32>
    %c1 = arith.constant 1 : index
    %c1_6 = arith.constant 1 : index
    %c0_7 = arith.constant 0 : index
    %4 = vector.load %arg5[%c1, %c1_6, %c0_7] : memref<18x18x4xf32, #tpu.memory_space<vmem>>, vector<16x16x4xf32>
    tpu.vector_store %arg5[%c1, %c1_6, %c0_7], %3 {strides = array<i32>} : memref<18x18x4xf32, #tpu.memory_space<vmem>>, vector<16x16x4xf32>,
    %c0_8 = arith.constant 0 : index
    %c0_9 = arith.constant 0 : index
    %5 = vector.load %arg2[%c0_8, %c0_9] : memref<36x128xf32, #tpu.memory_space<vmem>>, vector<36x128xf32>
    %cst_10 = arith.constant 0.000000e+00 : f32
    %6 = vector.broadcast %cst_10 : f32 to vector<256x128xf32>
    %c0_11 = arith.constant 0 : index
    %c0_12 = arith.constant 0 : index
    %c0_13 = arith.constant 0 : index
    %7 = vector.load %arg5[%c0_11, %c0_12, %c0_13] : memref<18x18x4xf32, #tpu.memory_space<vmem>>, vector<16x16x4xf32>
    %8 = vector.shape_cast %7 : vector<16x16x4xf32> to vector<256x4xf32>
    %9 = vector.extract_strided_slice %5 {offsets = [0, 0], sizes = [4, 128], strides = [1, 1]} : vector<36x128xf32> to vector<4x128xf32>
    %cst_14 = arith.constant dense<0.000000e+00> : vector<256x128xf32>
    %10 = tpu.matmul %8, %9, %cst_14 {dimension_numbers = #tpu.dot_dimension_numbers<[1], [0], [0], [1], [0, 0, 1, 1], [], []>} : vector<256x4xf32>, vector<4x128xf32>, vector<256x128xf32> -> vector<256x128xf32>
    %11 = arith.addf %6, %10 : vector<256x128xf32>
    %c0_15 = arith.constant 0 : index
    %c1_16 = arith.constant 1 : index
    %c0_17 = arith.constant 0 : index
    %12 = vector.load %arg5[%c0_15, %c1_16, %c0_17] : memref<18x18x4xf32, #tpu.memory_space<vmem>>, vector<16x16x4xf32>
    %13 = vector.shape_cast %12 : vector<16x16x4xf32> to vector<256x4xf32>
    %14 = vector.extract_strided_slice %5 {offsets = [4, 0], sizes = [4, 128], strides = [1, 1]} : vector<36x128xf32> to vector<4x128xf32>
    %cst_18 = arith.constant dense<0.000000e+00> : vector<256x128xf32>
    %15 = tpu.matmul %13, %14, %cst_18 {dimension_numbers = #tpu.dot_dimension_numbers<[1], [0], [0], [1], [0, 0, 1, 1], [], []>} : vector<256x4xf32>, vector<4x128xf32>, vector<256x128xf32> -> vector<256x128xf32>
    %16 = arith.addf %11, %15 : vector<256x128xf32>
    %c0_19 = arith.constant 0 : index
    %c2 = arith.constant 2 : index
    %c0_20 = arith.constant 0 : index
    %17 = vector.load %arg5[%c0_19, %c2, %c0_20] : memref<18x18x4xf32, #tpu.memory_space<vmem>>, vector<16x16x4xf32>
    %18 = vector.shape_cast %17 : vector<16x16x4xf32> to vector<256x4xf32>
    %19 = vector.extract_strided_slice %5 {offsets = [8, 0], sizes = [4, 128], strides = [1, 1]} : vector<36x128xf32> to vector<4x128xf32>
    %cst_21 = arith.constant dense<0.000000e+00> : vector<256x128xf32>
    %20 = tpu.matmul %18, %19, %cst_21 {dimension_numbers = #tpu.dot_dimension_numbers<[1], [0], [0], [1], [0, 0, 1, 1], [], []>} : vector<256x4xf32>, vector<4x128xf32>, vector<256x128xf32> -> vector<256x128xf32>
    %21 = arith.addf %16, %20 : vector<256x128xf32>
    %c1_22 = arith.constant 1 : index
    %c0_23 = arith.constant 0 : index
    %c0_24 = arith.constant 0 : index
    %22 = vector.load %arg5[%c1_22, %c0_23, %c0_24] : memref<18x18x4xf32, #tpu.memory_space<vmem>>, vector<16x16x4xf32>
    %23 = vector.shape_cast %22 : vector<16x16x4xf32> to vector<256x4xf32>
    %24 = vector.extract_strided_slice %5 {offsets = [12, 0], sizes = [4, 128], strides = [1, 1]} : vector<36x128xf32> to vector<4x128xf32>
    %cst_25 = arith.constant dense<0.000000e+00> : vector<256x128xf32>
    %25 = tpu.matmul %23, %24, %cst_25 {dimension_numbers = #tpu.dot_dimension_numbers<[1], [0], [0], [1], [0, 0, 1, 1], [], []>} : vector<256x4xf32>, vector<4x128xf32>, vector<256x128xf32> -> vector<256x128xf32>
    %26 = arith.addf %21, %25 : vector<256x128xf32>
    %c1_26 = arith.constant 1 : index
    %c1_27 = arith.constant 1 : index
    %c0_28 = arith.constant 0 : index
    %27 = vector.load %arg5[%c1_26, %c1_27, %c0_28] : memref<18x18x4xf32, #tpu.memory_space<vmem>>, vector<16x16x4xf32>
    %28 = vector.shape_cast %27 : vector<16x16x4xf32> to vector<256x4xf32>
    %29 = vector.extract_strided_slice %5 {offsets = [16, 0], sizes = [4, 128], strides = [1, 1]} : vector<36x128xf32> to vector<4x128xf32>
    %cst_29 = arith.constant dense<0.000000e+00> : vector<256x128xf32>
    %30 = tpu.matmul %28, %29, %cst_29 {dimension_numbers = #tpu.dot_dimension_numbers<[1], [0], [0], [1], [0, 0, 1, 1], [], []>} : vector<256x4xf32>, vector<4x128xf32>, vector<256x128xf32> -> vector<256x128xf32>
    %31 = arith.addf %26, %30 : vector<256x128xf32>
    %c1_30 = arith.constant 1 : index
    %c2_31 = arith.constant 2 : index
    %c0_32 = arith.constant 0 : index
    %32 = vector.load %arg5[%c1_30, %c2_31, %c0_32] : memref<18x18x4xf32, #tpu.memory_space<vmem>>, vector<16x16x4xf32>
    %33 = vector.shape_cast %32 : vector<16x16x4xf32> to vector<256x4xf32>
    %34 = vector.extract_strided_slice %5 {offsets = [20, 0], sizes = [4, 128], strides = [1, 1]} : vector<36x128xf32> to vector<4x128xf32>
    %cst_33 = arith.constant dense<0.000000e+00> : vector<256x128xf32>
    %35 = tpu.matmul %33, %34, %cst_33 {dimension_numbers = #tpu.dot_dimension_numbers<[1], [0], [0], [1], [0, 0, 1, 1], [], []>} : vector<256x4xf32>, vector<4x128xf32>, vector<256x128xf32> -> vector<256x128xf32>
    %36 = arith.addf %31, %35 : vector<256x128xf32>
    %c2_34 = arith.constant 2 : index
    %c0_35 = arith.constant 0 : index
    %c0_36 = arith.constant 0 : index
    %37 = vector.load %arg5[%c2_34, %c0_35, %c0_36] : memref<18x18x4xf32, #tpu.memory_space<vmem>>, vector<16x16x4xf32>
    %38 = vector.shape_cast %37 : vector<16x16x4xf32> to vector<256x4xf32>
    %39 = vector.extract_strided_slice %5 {offsets = [24, 0], sizes = [4, 128], strides = [1, 1]} : vector<36x128xf32> to vector<4x128xf32>
    %cst_37 = arith.constant dense<0.000000e+00> : vector<256x128xf32>
    %40 = tpu.matmul %38, %39, %cst_37 {dimension_numbers = #tpu.dot_dimension_numbers<[1], [0], [0], [1], [0, 0, 1, 1], [], []>} : vector<256x4xf32>, vector<4x128xf32>, vector<256x128xf32> -> vector<256x128xf32>
    %41 = arith.addf %36, %40 : vector<256x128xf32>
    %c2_38 = arith.constant 2 : index
    %c1_39 = arith.constant 1 : index
    %c0_40 = arith.constant 0 : index
    %42 = vector.load %arg5[%c2_38, %c1_39, %c0_40] : memref<18x18x4xf32, #tpu.memory_space<vmem>>, vector<16x16x4xf32>
    %43 = vector.shape_cast %42 : vector<16x16x4xf32> to vector<256x4xf32>
    %44 = vector.extract_strided_slice %5 {offsets = [28, 0], sizes = [4, 128], strides = [1, 1]} : vector<36x128xf32> to vector<4x128xf32>
    %cst_41 = arith.constant dense<0.000000e+00> : vector<256x128xf32>
    %45 = tpu.matmul %43, %44, %cst_41 {dimension_numbers = #tpu.dot_dimension_numbers<[1], [0], [0], [1], [0, 0, 1, 1], [], []>} : vector<256x4xf32>, vector<4x128xf32>, vector<256x128xf32> -> vector<256x128xf32>
    %46 = arith.addf %41, %45 : vector<256x128xf32>
    %c2_42 = arith.constant 2 : index
    %c2_43 = arith.constant 2 : index
    %c0_44 = arith.constant 0 : index
    %47 = vector.load %arg5[%c2_42, %c2_43, %c0_44] : memref<18x18x4xf32, #tpu.memory_space<vmem>>, vector<16x16x4xf32>
    %48 = vector.shape_cast %47 : vector<16x16x4xf32> to vector<256x4xf32>
    %49 = vector.extract_strided_slice %5 {offsets = [32, 0], sizes = [4, 128], strides = [1, 1]} : vector<36x128xf32> to vector<4x128xf32>
    %cst_45 = arith.constant dense<0.000000e+00> : vector<256x128xf32>
    %50 = tpu.matmul %48, %49, %cst_45 {dimension_numbers = #tpu.dot_dimension_numbers<[1], [0], [0], [1], [0, 0, 1, 1], [], []>} : vector<256x4xf32>, vector<4x128xf32>, vector<256x128xf32> -> vector<256x128xf32>
    %51 = arith.addf %46, %50 : vector<256x128xf32>
    %c0_46 = arith.constant 0 : index
    %c0_47 = arith.constant 0 : index
    %52 = vector.load %arg3[%c0_46, %c0_47] : memref<1x128xf32, #tpu.memory_space<vmem>>, vector<1x128xf32>
    %53 = vector.broadcast %52 : vector<1x128xf32> to vector<256x128xf32>
    %54 = arith.addf %51, %53 : vector<256x128xf32>
    %cst_48 = arith.constant 0.000000e+00 : f32
    %55 = vector.broadcast %cst_48 : f32 to vector<256x128xf32>
    %56 = arith.maximumf %54, %55 : vector<256x128xf32>
    %57 = vector.shape_cast %56 : vector<256x128xf32> to vector<16x16x128xf32>
    %c0_49 = arith.constant 0 : index
    %c0_50 = arith.constant 0 : index
    %c0_51 = arith.constant 0 : index
    %58 = vector.load %arg6[%c0_49, %c0_50, %c0_51] : memref<16x16x128xf32, #tpu.memory_space<vmem>>, vector<16x16x128xf32>
    tpu.vector_store %arg6[%c0_49, %c0_50, %c0_51], %57 {strides = array<i32>} : memref<16x16x128xf32, #tpu.memory_space<vmem>>, vector<16x16x128xf32>,
    %c0_52 = arith.constant 0 : index
    %c0_53 = arith.constant 0 : index
    %c0_54 = arith.constant 0 : index
    %59 = tpu.strided_load %arg6[%c0_52, %c0_53, %c0_54] {strides = array<i32: 1, 2, 1>} : memref<16x16x128xf32, #tpu.memory_space<vmem>>, vector<16x8x128xf32>
    %c0_55 = arith.constant 0 : index
    %c1_56 = arith.constant 1 : index
    %c0_57 = arith.constant 0 : index
    %60 = tpu.strided_load %arg6[%c0_55, %c1_56, %c0_57] {strides = array<i32: 1, 2, 1>} : memref<16x16x128xf32, #tpu.memory_space<vmem>>, vector<16x8x128xf32>
    %61 = arith.maximumf %59, %60 : vector<16x8x128xf32>
    %62 = vector.shape_cast %61 : vector<16x8x128xf32> to vector<8x2x8x128xf32>
    %63 = vector.extract_strided_slice %62 {offsets = [0, 0, 0, 0], sizes = [8, 1, 8, 128], strides = [1, 1, 1, 1]} : vector<8x2x8x128xf32> to vector<8x1x8x128xf32>
    %64 = vector.shape_cast %63 : vector<8x1x8x128xf32> to vector<8x8x128xf32>
    %65 = vector.extract_strided_slice %62 {offsets = [0, 1, 0, 0], sizes = [8, 1, 8, 128], strides = [1, 1, 1, 1]} : vector<8x2x8x128xf32> to vector<8x1x8x128xf32>
    %66 = vector.shape_cast %65 : vector<8x1x8x128xf32> to vector<8x8x128xf32>
    %67 = arith.maximumf %64, %66 : vector<8x8x128xf32>
    %68 = vector.shape_cast %67 : vector<8x8x128xf32> to vector<64x128xf32>
    %c0_58 = arith.constant 0 : index
    %c0_59 = arith.constant 0 : index
    %c0_60 = arith.constant 0 : index
    %69 = vector.load %arg4[%c0_58, %c0_59, %c0_60] : memref<1x64x128xf32, #tpu.memory_space<vmem>>, vector<1x64x128xf32>
    %70 = vector.shape_cast %69 : vector<1x64x128xf32> to vector<64x128xf32>
    %71 = vector.shape_cast %68 : vector<64x128xf32> to vector<1x64x128xf32>
    tpu.vector_store %arg4[%c0_58, %c0_59, %c0_60], %71 {strides = array<i32>} : memref<1x64x128xf32, #tpu.memory_space<vmem>>, vector<1x64x128xf32>,
    return
  }
  func.func @transform_0(%arg0: i32) -> (i32, i32, i32, i32) {
    %c0_i32 = arith.constant 0 : i32
    %c0_i32_0 = arith.constant 0 : i32
    %c0_i32_1 = arith.constant 0 : i32
    %c0_i32_2 = arith.constant 0 : i32
    return %arg0, %c0_i32, %c0_i32_0, %c0_i32_1 : i32, i32, i32, i32
  }
  func.func @transform_1(%arg0: i32) -> (i32, i32) {
    %c0_i32 = arith.constant 0 : i32
    %c0_i32_0 = arith.constant 0 : i32
    %c0_i32_1 = arith.constant 0 : i32
    return %c0_i32, %c0_i32_0 : i32, i32
  }
  func.func @transform_2(%arg0: i32) -> (i32, i32) {
    %c0_i32 = arith.constant 0 : i32
    %c0_i32_0 = arith.constant 0 : i32
    %c0_i32_1 = arith.constant 0 : i32
    return %c0_i32, %c0_i32_0 : i32, i32
  }
  func.func @transform_3(%arg0: i32) -> (i32, i32, i32) {
    %c0_i32 = arith.constant 0 : i32
    %c0_i32_0 = arith.constant 0 : i32
    %c0_i32_1 = arith.constant 0 : i32
    return %arg0, %c0_i32, %c0_i32_0 : i32, i32, i32
  }
}

</mosaic_0001>

<bundles_post_ra>
// kernel: tpu_custom_call.1
= control target key start
LH: loop header
LB: loop body
LE: loop exit
PB: predicated region body
PF: predicated region fallthrough
CT: control target
= control target key end

     0   :  { %8 = vsyncpa [#allocation5], 0  ;;  %s6564_s0 = inlined_call_operand.vmem [shape: f32[2,16,16,4], index: 0, kind: input, shape index: {}]   ;;  %s6565_s1 = inlined_call_operand.vmem [shape: f32[36,128], index: 1, kind: input, shape index: {}]   ;;  %s6566_s2 = inlined_call_operand.vmem [shape: f32[1,128], index: 2, kind: input, shape index: {}]   ;;  %s6567_s3 = inlined_call_operand.hbm [shape: f32[2,64,128], index: 3, kind: output, shape index: {}]  }
   0x1   :  { %10 = vsyncpa [#allocation5 + $0x1], 0  ;;  %s5446_s12 = smov 0   ;;  %s5448_s13 = smov 0  }
   0x2   :  { %s5450_s14 = smov 0   ;;  %s5452_s15 = smov 0  }
   0x3 LB: > { %s5467_s16 = sadd.s32 4294967295, %s5420_s15   ;;  %s3999_s17 = sadd.s32 4294967294, %s5420_s15   ;;  %s5420_s15 = sphi %s5452_s15, %s6688_s15   ;;  %s5416_s14 = sphi %s5450_s14, %s6687_s14   ;;  %s5412_s13 = sphi %s5448_s13, %s6686_s13   ;;  %s5408_s12 = sphi %s5446_s12, %s6685_s12  }
   0x4   : > { %s5471_s18 = sadd.s32 1, %s5420_s15   ;;  %s91_s19 = sadd.s32 1, %s5416_s14 }
   0x5   : > { %s88_s20 = ssub.s32 %s5420_s15, %s5471_s18  ;;  %p101_p0 = scmp.ne.s32.totalorder %s5416_s14, %s5412_s13 }
   0x6   : > { %p89_p1 = scmp.eq.s32.totalorder %s88_s20, 0  ;;  %p102_p2 = scmp.eq.s32.totalorder %s5467_s16, 1 }
   0x7   : > { %p107_p3 = scmp.ne.s32.totalorder %s5412_s13, %s5408_s12  ;;  %p108_p4 = scmp.eq.s32.totalorder %s3999_s17, 1 }
   0x8   : > { %s5482_s21 = scalar_select %p89_p1, %s5416_s14, %s91_s19  }
   0x9   : > { %p5484_p5 = por %p102_p2, %p101_p0  ;;  %p5488_p6 = por %p108_p4, %p107_p3 }
   0xa   : > { %p4002_p7 = scmp.ge.s32.totalorder %s5420_s15, 1  ;;  %p140_p8 = scmp.lt.s32.totalorder %s5420_s15, 3 }
   0xc   : > { %p141_p9 = pnand %p4002_p7, %p140_p8 }
   0xe   : > { %144 = sbr.rel (%p141_p9) target bundleno = 588 (0x24c), region = 32 }
  0x15   : > { %v5497_v0 = vld [vmem:[%s6565_s1] sm:$0xff]  ;;  %vm457_vm0 = vcmask 1043456   ;;  %vm169_vm1 = vcmask 31744   ;;  %vm172_vm2 = vcmask 25600   ;;  %v5502_v1 = vld [vmem:[%s6565_s1 + $0x10] sm:$0xff]  ;;  %v5422_v3 = vmov 0.0  }
  0x16   : > { %v360_v2 = vrot.slane %v5497_v0, 4  ;;  %170 = vst.msk [vmem:[#allocation2] sm:$0xff] %vm169_vm1, %v5422_v3  ;;  %171 = vst.msk [vmem:[#allocation2 + $0x8] sm:$0xff] %vm169_vm1, %v5422_v3  ;;  %4808 = vmatprep.subr.msk.mxu0 %vm457_vm0, %v5502_v1  ;;  %p164_p10 = scmp.lt.s32.totalorder %s5467_s16, 1  ;;  %v2204_v4 = vrot.slane %v5502_v1, 4  ;;  %v5588_v8 = vld [vmem:[%s6565_s1 + $0x8] sm:$0xff] }
  0x17   : > { %174 = vst.msk [vmem:[#allocation2 + $0x18] sm:$0xff] %vm169_vm1, %v5422_v3  ;;  %175 = vst.msk [vmem:[#allocation2 + $0x20] sm:$0xff] %vm169_vm1, %v5422_v3  ;;  %4809 = vmatpush3.msk.msra.mxu0 %vm457_vm0, %v5502_v1  ;;  %v5644_v33 = vld [vmem:[%s6565_s1 + $0x18] sm:$0xff]  ;;  %s161_s20 = sand.u32 1, %s5412_s13   ;;  %s4310_s26 = sshll.u32 %s5467_s16, 10 }
  0x18   : > { %177 = vst.msk [vmem:[#allocation2 + $0x30] sm:$0xff] %vm169_vm1, %v5422_v3  ;;  %178 = vst.msk [vmem:[#allocation2 + $0x38] sm:$0xff] %vm169_vm1, %v5422_v3  ;;  %4608 = vmatprep.subr.msk.mxu1 %vm457_vm0, %v360_v2  ;;  %s165_s28 = scalar_select %p164_p10, %s5467_s16, 1  ;;  %4858 = vmatprep.subr.msk.mxu0 %vm457_vm0, %v2204_v4  ;;  %v6569_v61 = vrot.slane %v5644_v33, 4 }
  0x19   : > { %180 = vst.msk [vmem:[#allocation2 + $0x48] sm:$0xff] %vm169_vm1, %v5422_v3  ;;  %181 = vst.msk [vmem:[#allocation2 + $0x50] sm:$0xff] %vm169_vm1, %v5422_v3  ;;  %4609 = vmatpush3.msk.msra.mxu1 %vm457_vm0, %v360_v2  ;;  %s4003_s24 = sshll.u32 %s161_s20, 6  ;;  %s6516_s30 = scalar_lea.hbm %s6567_s3, %s4310_s26 }
  0x1a   : > { %183 = vst.msk [vmem:[#allocation2 + $0x60] sm:$0xff] %vm169_vm1, %v5422_v3  ;;  %184 = vst.msk [vmem:[#allocation2 + $0x68] sm:$0xff] %vm169_vm1, %v5422_v3  ;;  %s4309_s29 = sshll.u32 %s165_s28, 8  ;;  %4658 = vmatprep.subr.msk.mxu1 %vm457_vm0, %v5497_v0  ;;  %s6477_s25 = scalar_lea.vmem [#allocation4], %s4003_s24 }
  0x1b   : > { %186 = vst.msk [vmem:[#allocation2 + $0x78] sm:$0xff] %vm169_vm1, %v5422_v3  ;;  %187 = vst.msk [vmem:[#allocation2 + $0x80] sm:$0xff] %vm169_vm1, %v5422_v3  ;;  %s5580_s5 = scalar_lea.vmem %s6564_s0, %s4309_s29  ;;  %s3937_s27 = sshll.u32 %s6477_s25, 4  ;;  %s6518_s27 = int_to_ptr.vmem [resolvable:$true] %s3937_s27 }
  0x1c   : > { %189 = vst.msk [vmem:[#allocation2 + $0x90] sm:$0xff] %vm169_vm1, %v5422_v3  ;;  %190 = vst.msk [vmem:[#allocation2 + $0x98] sm:$0xff] %vm169_vm1, %v5422_v3  ;;  %v225_v5 = vld [vmem:[%s5580_s5] sm:$0xff]  ;;  %v226_v6 = vld [vmem:[%s5580_s5 + $0x8] sm:$0xff]  ;;  %s6523_s4 = scalar_lea.sflag [#allocation5], %s161_s20  ;;  %s5358_s16 = scalar_lea.vmem %s6518_s27, 1024 }
  0x1d   : > { %192 = vst.msk [vmem:[#allocation2 + $0xa8] sm:$0xff] %vm169_vm1, %v5422_v3  ;;  %193 = vst.msk [vmem:[#allocation2 + $0xb0] sm:$0xff] %vm169_vm1, %v5422_v3  ;;  %v227_v7 = vld [vmem:[%s5580_s5 + $0x10] sm:$0xff]  ;;  %v327_v9 = vld [vmem:[#allocation2 + $0x1] sm:$0xff]  ;;  %p5359_p11 = scmp.ne.s32.totalorder %s6518_s27, %s5358_s16 }
  0x1e   : > { %195 = vst.msk [vmem:[#allocation2 + $0xc0] sm:$0xff] %vm169_vm1, %v5422_v3  ;;  %196 = vst.msk [vmem:[#allocation2 + $0xc8] sm:$0xff] %vm169_vm1, %v5422_v3  ;;  %v228_v11 = vld [vmem:[%s5580_s5 + $0x18] sm:$0xff]  ;;  %4610 = vmatprep.mubr.msk.f32.mxu1 %vm169_vm1, %v327_v9  ;;  %v229_v12 = vld [vmem:[%s5580_s5 + $0x20] sm:$0xff] }
  0x1f   : > { %198 = vst.msk [vmem:[#allocation2 + $0xd8] sm:$0xff] %vm169_vm1, %v5422_v3  ;;  %199 = vst.msk [vmem:[#allocation2 + $0xe0] sm:$0xff] %vm169_vm1, %v5422_v3  ;;  %v230_v13 = vld [vmem:[%s5580_s5 + $0x28] sm:$0xff]  ;;  %v231_v14 = vld [vmem:[%s5580_s5 + $0x30] sm:$0xff]  ;;  %p5360_p12 = pnand %p5359_p11, %p5484_p5 }
  0x20   : > { %201 = vst.msk [vmem:[#allocation2 + $0xf0] sm:$0xff] %vm169_vm1, %v5422_v3  ;;  %202 = vst.msk [vmem:[#allocation2 + $0xf8] sm:$0xff] %vm169_vm1, %v5422_v3  ;;  %v232_v15 = vld [vmem:[%s5580_s5 + $0x38] sm:$0xff]  ;;  %v233_v16 = vld [vmem:[%s5580_s5 + $0x40] sm:$0xff] }
  0x21   : > { %204 = vst.msk [vmem:[#allocation2 + $0x108] sm:$0xff] %vm169_vm1, %v5422_v3  ;;  %205 = vst.msk [vmem:[#allocation2 + $0x110] sm:$0xff] %vm169_vm1, %v5422_v3  ;;  %v234_v17 = vld [vmem:[%s5580_s5 + $0x48] sm:$0xff]  ;;  %v235_v18 = vld [vmem:[%s5580_s5 + $0x50] sm:$0xff]  ;;  %p5361_p13 = pneg %p5360_p12 }
  0x22   : > { %207 = vst.msk [vmem:[#allocation2 + $0x120] sm:$0xff] %vm169_vm1, %v5422_v3  ;;  %208 = vst.msk [vmem:[#allocation2 + $0x128] sm:$0xff] %vm169_vm1, %v5422_v3  ;;  %v236_v19 = vld [vmem:[%s5580_s5 + $0x58] sm:$0xff]  ;;  %v237_v20 = vld [vmem:[%s5580_s5 + $0x60] sm:$0xff] }
  0x23   : > { %210 = vst.msk [vmem:[#allocation2 + $0x138] sm:$0xff] %vm169_vm1, %v5422_v3  ;;  %211 = vst.msk [vmem:[#allocation2 + $0x140] sm:$0xff] %vm169_vm1, %v5422_v3  ;;  %v238_v21 = vld [vmem:[%s5580_s5 + $0x68] sm:$0xff]  ;;  %v239_v22 = vld [vmem:[%s5580_s5 + $0x70] sm:$0xff] }
  0x24   : > { %213 = vst.msk [vmem:[#allocation2 + $0x150] sm:$0xff] %vm169_vm1, %v5422_v3  ;;  %214 = vst.msk [vmem:[#allocation2 + $0x158] sm:$0xff] %vm169_vm1, %v5422_v3  ;;  %v240_v23 = vld [vmem:[%s5580_s5 + $0x78] sm:$0xff]  ;;  %v241_v24 = vld [vmem:[%s5580_s5 + $0x80] sm:$0xff] }
  0x25   : > { %216 = vst.msk [vmem:[#allocation2 + $0x168] sm:$0xff] %vm169_vm1, %v5422_v3  ;;  %217 = vst.msk [vmem:[#allocation2 + $0x170] sm:$0xff] %vm169_vm1, %v5422_v3  ;;  %v242_v25 = vld [vmem:[%s5580_s5 + $0x88] sm:$0xff]  ;;  %v243_v26 = vld [vmem:[%s5580_s5 + $0x90] sm:$0xff] }
  0x26   : > { %219 = vst.msk [vmem:[#allocation2 + $0x180] sm:$0xff] %vm169_vm1, %v5422_v3  ;;  %220 = vst.msk [vmem:[#allocation2 + $0x188] sm:$0xff] %vm169_vm1, %v5422_v3  ;;  %v244_v27 = vld [vmem:[%s5580_s5 + $0x98] sm:$0xff]  ;;  %v245_v28 = vld [vmem:[%s5580_s5 + $0xa0] sm:$0xff] }
  0x27   : > { %222 = vst.msk [vmem:[#allocation2 + $0x198] sm:$0xff] %vm169_vm1, %v5422_v3  ;;  %223 = vst.msk [vmem:[#allocation2 + $0x1a0] sm:$0xff] %vm169_vm1, %v5422_v3  ;;  %v246_v29 = vld [vmem:[%s5580_s5 + $0xa8] sm:$0xff]  ;;  %v247_v38 = vld [vmem:[%s5580_s5 + $0xb0] sm:$0xff] }
  0x28   : > { %173 = vst.msk [vmem:[#allocation2 + $0x10] sm:$0x3] %vm172_vm2, %v5422_v3  ;;  %176 = vst.msk [vmem:[#allocation2 + $0x28] sm:$0x3] %vm172_vm2, %v5422_v3  ;;  %v248_v39 = vld [vmem:[%s5580_s5 + $0xb8] sm:$0xff]  ;;  %v249_v40 = vld [vmem:[%s5580_s5 + $0xc0] sm:$0xff] }
  0x29   : > { %179 = vst.msk [vmem:[#allocation2 + $0x40] sm:$0x3] %vm172_vm2, %v5422_v3  ;;  %182 = vst.msk [vmem:[#allocation2 + $0x58] sm:$0x3] %vm172_vm2, %v5422_v3  ;;  %v250_v42 = vld [vmem:[%s5580_s5 + $0xc8] sm:$0xff]  ;;  %v251_v44 = vld [vmem:[%s5580_s5 + $0xd0] sm:$0xff] }
  0x2a   : > { %185 = vst.msk [vmem:[#allocation2 + $0x70] sm:$0x3] %vm172_vm2, %v5422_v3  ;;  %188 = vst.msk [vmem:[#allocation2 + $0x88] sm:$0x3] %vm172_vm2, %v5422_v3  ;;  %v252_v45 = vld [vmem:[%s5580_s5 + $0xd8] sm:$0xff]  ;;  %v253_v46 = vld [vmem:[%s5580_s5 + $0xe0] sm:$0xff] }
  0x2b   : > { %191 = vst.msk [vmem:[#allocation2 + $0xa0] sm:$0x3] %vm172_vm2, %v5422_v3  ;;  %194 = vst.msk [vmem:[#allocation2 + $0xb8] sm:$0x3] %vm172_vm2, %v5422_v3  ;;  %v254_v47 = vld [vmem:[%s5580_s5 + $0xe8] sm:$0xff]  ;;  %v255_v57 = vld [vmem:[%s5580_s5 + $0xf0] sm:$0xff] }
  0x2c   : > { %197 = vst.msk [vmem:[#allocation2 + $0xd0] sm:$0x3] %vm172_vm2, %v5422_v3  ;;  %200 = vst.msk [vmem:[#allocation2 + $0xe8] sm:$0x3] %vm172_vm2, %v5422_v3  ;;  %v256_v58 = vld [vmem:[%s5580_s5 + $0xf8] sm:$0xff]  ;;  %s5423_s5 = smov [#allocation4]  }
  0x2d   : > { %203 = vst.msk [vmem:[#allocation2 + $0x100] sm:$0x3] %vm172_vm2, %v5422_v3  ;;  %206 = vst.msk [vmem:[#allocation2 + $0x118] sm:$0x3] %vm172_vm2, %v5422_v3  ;;  %s5362_s6 = sshll.u32 %s5423_s5, 4  ;;  %s5363_s6 = int_to_ptr.vmem [resolvable:$false] %s5362_s6 }
  0x2e   : > { %209 = vst.msk [vmem:[#allocation2 + $0x130] sm:$0x3] %vm172_vm2, %v5422_v3  ;;  %212 = vst.msk [vmem:[#allocation2 + $0x148] sm:$0x3] %vm172_vm2, %v5422_v3  ;;  %s5364_s7 = scalar_lea.vmem %s5363_s6, 2048  ;;  %p5365_p0 = scmp.lt.s32.totalorder %s6518_s27, %s5363_s6 }
  0x2f   : > { %215 = vst.msk [vmem:[#allocation2 + $0x160] sm:$0x3] %vm172_vm2, %v5422_v3  ;;  %218 = vst.msk [vmem:[#allocation2 + $0x178] sm:$0x3] %vm172_vm2, %v5422_v3  ;;  %v328_v10 = vld [vmem:[#allocation2 + $0x9] sm:$0xff]  ;;  %p5366_p1 = scmp.lt.s32.totalorder %s5364_s7, %s5358_s16 }
  0x30   : > { %221 = vst.msk [vmem:[#allocation2 + $0x190] sm:$0x3] %vm172_vm2, %v5422_v3  ;;  %224 = vst.msk [vmem:[#allocation2 + $0x1a8] sm:$0x3] %vm172_vm2, %v5422_v3  ;;  %4611 = vmatmul.mubr.msk.f32.vlgmr.msra.gmra.mrb[0].mxu1 %vm169_vm1, %v328_v10 }
  0x31   : > { %258 = vst.msk [vmem:[#allocation2 + $0x19] sm:$0xff] %vm169_vm1, %v225_v5  ;;  %259 = vst.msk [vmem:[#allocation2 + $0x21] sm:$0xff] %vm169_vm1, %v226_v6  ;;  %4659 = vmatpush3.msk.msra.mxu1 %vm457_vm0, %v5497_v0  ;;  %p5367_p2 = por %p5366_p1, %p5365_p0 }
  0x32   : > { %260 = vst.msk [vmem:[#allocation2 + $0x31] sm:$0xff] %vm169_vm1, %v227_v7  ;;  %261 = vst.msk [vmem:[#allocation2 + $0x39] sm:$0xff] %vm169_vm1, %v228_v11  ;;  %4708 = vmatprep.subr.msk.mxu1 %vm457_vm0, %v5588_v8 }
  0x33   : > { %262 = vst.msk [vmem:[#allocation2 + $0x49] sm:$0xff] %vm169_vm1, %v229_v12  ;;  %263 = vst.msk [vmem:[#allocation2 + $0x51] sm:$0xff] %vm169_vm1, %v230_v13  ;;  %p5368_p3 = pnand %p5367_p2, %p5361_p13 }
  0x34   : > { %264 = vst.msk [vmem:[#allocation2 + $0x61] sm:$0xff] %vm169_vm1, %v231_v14  ;;  %265 = vst.msk [vmem:[#allocation2 + $0x69] sm:$0xff] %vm169_vm1, %v232_v15 }
  0x35   : > { %266 = vst.msk [vmem:[#allocation2 + $0x79] sm:$0xff] %vm169_vm1, %v233_v16  ;;  %267 = vst.msk [vmem:[#allocation2 + $0x81] sm:$0xff] %vm169_vm1, %v234_v17 }
  0x36   : > { %268 = vst.msk [vmem:[#allocation2 + $0x91] sm:$0xff] %vm169_vm1, %v235_v18  ;;  %269 = vst.msk [vmem:[#allocation2 + $0x99] sm:$0xff] %vm169_vm1, %v236_v19 }
  0x37   : > { %270 = vst.msk [vmem:[#allocation2 + $0xa9] sm:$0xff] %vm169_vm1, %v237_v20  ;;  %271 = vst.msk [vmem:[#allocation2 + $0xb1] sm:$0xff] %vm169_vm1, %v238_v21 }
  0x38   : > { %272 = vst.msk [vmem:[#allocation2 + $0xc1] sm:$0xff] %vm169_vm1, %v239_v22  ;;  %273 = vst.msk [vmem:[#allocation2 + $0xc9] sm:$0xff] %vm169_vm1, %v240_v23  ;;  %v329_v30 = vld [vmem:[#allocation2 + $0x19] sm:$0xff]  ;;  %v330_v31 = vld [vmem:[#allocation2 + $0x21] sm:$0xff] }
  0x39   : > { %274 = vst.msk [vmem:[#allocation2 + $0xd9] sm:$0xff] %vm169_vm1, %v241_v24  ;;  %275 = vst.msk [vmem:[#allocation2 + $0xe1] sm:$0xff] %vm169_vm1, %v242_v25  ;;  %v5634_v32 = vld [vmem:[#allocation2 + $0x31] sm:$0xff]  ;;  %4613 = vmatprep.mubr.msk.f32.mxu1 %vm169_vm1, %v329_v30  ;;  %4810 = vmatprep.mubr.msk.f32.mxu0 %vm169_vm1, %v329_v30  ;;  %v5653_v34 = vld [vmem:[#allocation2 + $0x39] sm:$0xff]  ;;  %v6568_v30 = vrot.slane %v5588_v8, 4 }
  0x3a   : > { %276 = vst.msk [vmem:[#allocation2 + $0xf1] sm:$0xff] %vm169_vm1, %v243_v26  ;;  %277 = vst.msk [vmem:[#allocation2 + $0xf9] sm:$0xff] %vm169_vm1, %v244_v27  ;;  %4614 = vmatmul.mubr.msk.f32.gmra.mrb[2].mxu1 %vm169_vm1, %v330_v31  ;;  %4811 = vmatmul.mubr.msk.f32.vlgmr.msra.gmra.mrb[0].mxu0 %vm169_vm1, %v330_v31  ;;  %v5657_v35 = vld [vmem:[#allocation2 + $0x49] sm:$0xff]  ;;  %v5669_v36 = vld [vmem:[#allocation2 + $0x51] sm:$0xff] }
  0x3b   : > { %278 = vst.msk [vmem:[#allocation2 + $0x109] sm:$0xff] %vm169_vm1, %v245_v28  ;;  %279 = vst.msk [vmem:[#allocation2 + $0x111] sm:$0xff] %vm169_vm1, %v246_v29  ;;  %4859 = vmatpush3.msk.msra.mxu0 %vm457_vm0, %v2204_v4  ;;  %4616 = vmatprep.mubr.msk.f32.mxu1 %vm169_vm1, %v5634_v32  ;;  %v5671_v37 = vld [vmem:[#allocation2 + $0x61] sm:$0xff]  ;;  %v5685_v41 = vld [vmem:[#allocation2 + $0x69] sm:$0xff] }
  0x3c   : > { %4813 = vmatprep.mubr.msk.f32.mxu0 %vm169_vm1, %v5634_v32  ;;  %4908 = vmatprep.subr.msk.mxu0 %vm457_vm0, %v5644_v33  ;;  %280 = vst.msk [vmem:[#allocation2 + $0x121] sm:$0xff] %vm169_vm1, %v247_v38  ;;  %281 = vst.msk [vmem:[#allocation2 + $0x129] sm:$0xff] %vm169_vm1, %v248_v39  ;;  %v5690_v43 = vld [vmem:[#allocation2 + $0x79] sm:$0xff]  ;;  %v5708_v48 = vld [vmem:[#allocation2 + $0x81] sm:$0xff] }
  0x3d   : > { %282 = vst.msk [vmem:[#allocation2 + $0x139] sm:$0xff] %vm169_vm1, %v249_v40  ;;  %283 = vst.msk [vmem:[#allocation2 + $0x141] sm:$0xff] %vm169_vm1, %v250_v42  ;;  %v5711_v49 = vld [vmem:[#allocation2 + $0x91] sm:$0xff]  ;;  %v5721_v50 = vld [vmem:[#allocation2 + $0x99] sm:$0xff] }
  0x3e   : > { %4617 = vmatmul.mubr.msk.f32.gmra.mrb[4].mxu1 %vm169_vm1, %v5653_v34  ;;  %4814 = vmatmul.mubr.msk.f32.gmra.mrb[2].mxu0 %vm169_vm1, %v5653_v34  ;;  %284 = vst.msk [vmem:[#allocation2 + $0x151] sm:$0xff] %vm169_vm1, %v251_v44  ;;  %285 = vst.msk [vmem:[#allocation2 + $0x159] sm:$0xff] %vm169_vm1, %v252_v45  ;;  %v5723_v51 = vld [vmem:[#allocation2 + $0xa9] sm:$0xff]  ;;  %v5733_v52 = vld [vmem:[#allocation2 + $0xb1] sm:$0xff] }
  0x3f   : > { %4619 = vmatprep.mubr.msk.f32.mxu1 %vm169_vm1, %v5657_v35  ;;  %4816 = vmatprep.mubr.msk.f32.mxu0 %vm169_vm1, %v5657_v35  ;;  %286 = vst.msk [vmem:[#allocation2 + $0x169] sm:$0xff] %vm169_vm1, %v253_v46  ;;  %287 = vst.msk [vmem:[#allocation2 + $0x171] sm:$0xff] %vm169_vm1, %v254_v47  ;;  %v5735_v53 = vld [vmem:[#allocation2 + $0xc1] sm:$0xff]  ;;  %v5745_v54 = vld [vmem:[#allocation2 + $0xc9] sm:$0xff] }
  0x40   : > { %6619 = vst [vmem:[#allocation7_spill] sm:$0xff] %v5735_v53  ;;  %6620 = vst [vmem:[#allocation8_spill] sm:$0xff] %v5745_v54  ;;  %v5747_v55 = vld [vmem:[#allocation2 + $0x1a] sm:$0xff]  ;;  %v5765_v60 = vld [vmem:[#allocation2 + $0x22] sm:$0xff] }
  0x41   : > { %v5749_v56 = vld [vmem:[#allocation2 + $0xd9] sm:$0xff]  ;;  %288 = vst.msk [vmem:[#allocation2 + $0x181] sm:$0xff] %vm169_vm1, %v255_v57  ;;  %289 = vst.msk [vmem:[#allocation2 + $0x189] sm:$0xff] %vm169_vm1, %v256_v58  ;;  %v5763_v59 = vld [vmem:[#allocation2 + $0xe1] sm:$0xff] }
  0x42   : > { %4620 = vmatmul.mubr.msk.f32.gmra.mrb[6].mxu1 %vm169_vm1, %v5669_v36  ;;  %4817 = vmatmul.mubr.msk.f32.gmra.mrb[4].mxu0 %vm169_vm1, %v5669_v36  ;;  %6621 = vst [vmem:[#allocation9_spill] sm:$0xff] %v5749_v56  ;;  %6622 = vst [vmem:[#allocation10_spill] sm:$0xff] %v5763_v59  ;;  %v5768_v62 = vld [vmem:[#allocation2 + $0xf1] sm:$0xff]  ;;  %v5780_v0 = vld [vmem:[#allocation2 + $0xf9] sm:$0xff] }
  0x43   : > { %4622 = vmatprep.mubr.msk.f32.mxu1 %vm169_vm1, %v5671_v37  ;;  %4819 = vmatprep.mubr.msk.f32.mxu0 %vm169_vm1, %v5671_v37  ;;  %6623 = vst [vmem:[#allocation11_spill] sm:$0xff] %v5768_v62  ;;  %v5770_v63 = vld [vmem:[#allocation2 + $0x32] sm:$0xff]  ;;  %6624 = vst [vmem:[#allocation12_spill] sm:$0xff] %v5780_v0  ;;  %v5782_v2 = vld [vmem:[#allocation2 + $0x3a] sm:$0xff] }
  0x44   : > { %v5786_v3 = vld [vmem:[#allocation2 + $0x109] sm:$0xff]  ;;  %v5801_v5 = vld [vmem:[#allocation2 + $0x111] sm:$0xff]  ;;  %v5805_v7 = vld [vmem:[#allocation2 + $0x121] sm:$0xff] }
  0x45   : > { %6625 = vst [vmem:[#allocation13_spill] sm:$0xff] %v5786_v3  ;;  %v5788_v4 = vld [vmem:[#allocation2 + $0x4a] sm:$0xff]  ;;  %6626 = vst [vmem:[#allocation14_spill] sm:$0xff] %v5801_v5  ;;  %v5803_v6 = vld [vmem:[#allocation2 + $0x52] sm:$0xff] }
  0x46   : > { %4623 = vmatmul.mubr.msk.f32.gmra.mrb[8].mxu1 %vm169_vm1, %v5685_v41  ;;  %4820 = vmatmul.mubr.msk.f32.gmra.mrb[6].mxu0 %vm169_vm1, %v5685_v41  ;;  %6627 = vst [vmem:[#allocation15_spill] sm:$0xff] %v5805_v7  ;;  %v5807_v9 = vld [vmem:[#allocation2 + $0x62] sm:$0xff]  ;;  %v5819_v11 = vld [vmem:[#allocation2 + $0x6a] sm:$0xff]  ;;  %v5821_v12 = vld [vmem:[#allocation2 + $0x139] sm:$0xff] }
  0x47   : > { %4625 = vmatprep.mubr.msk.f32.mxu1 %vm169_vm1, %v5690_v43  ;;  %4822 = vmatprep.mubr.msk.f32.mxu0 %vm169_vm1, %v5690_v43  ;;  %v5817_v10 = vld [vmem:[#allocation2 + $0x129] sm:$0xff]  ;;  %6629 = vst [vmem:[#allocation17_spill] sm:$0xff] %v5821_v12  ;;  %v5823_v13 = vld [vmem:[#allocation2 + $0x7a] sm:$0xff]  ;;  %v5837_v16 = vld [vmem:[#allocation2 + $0x151] sm:$0xff] }
  0x48   : > { %6628 = vst [vmem:[#allocation16_spill] sm:$0xff] %v5817_v10  ;;  %v5833_v14 = vld [vmem:[#allocation2 + $0x141] sm:$0xff]  ;;  %6631 = vst [vmem:[#allocation19_spill] sm:$0xff] %v5837_v16  ;;  %v5839_v17 = vld [vmem:[#allocation2 + $0x92] sm:$0xff] }
  0x49   : > { %6630 = vst [vmem:[#allocation18_spill] sm:$0xff] %v5833_v14  ;;  %v5835_v15 = vld [vmem:[#allocation2 + $0x82] sm:$0xff]  ;;  %v5849_v18 = vld [vmem:[#allocation2 + $0x159] sm:$0xff]  ;;  %v5855_v21 = vld [vmem:[#allocation2 + $0xaa] sm:$0xff] }
  0x4a   : > { %4626 = vmatmul.mubr.msk.f32.gmra.mrb[10].mxu1 %vm169_vm1, %v5708_v48  ;;  %4823 = vmatmul.mubr.msk.f32.gmra.mrb[8].mxu0 %vm169_vm1, %v5708_v48  ;;  %6632 = vst [vmem:[#allocation20_spill] sm:$0xff] %v5849_v18  ;;  %v5851_v19 = vld [vmem:[#allocation2 + $0x9a] sm:$0xff]  ;;  %v5853_v20 = vld [vmem:[#allocation2 + $0x169] sm:$0xff]  ;;  %v5865_v22 = vld [vmem:[#allocation2 + $0x171] sm:$0xff] }
  0x4b   : > { %4628 = vmatprep.mubr.msk.f32.mxu1 %vm169_vm1, %v5711_v49  ;;  %4825 = vmatprep.mubr.msk.f32.mxu0 %vm169_vm1, %v5711_v49  ;;  %6633 = vst [vmem:[#allocation21_spill] sm:$0xff] %v5853_v20  ;;  %6634 = vst [vmem:[#allocation22_spill] sm:$0xff] %v5865_v22  ;;  %v5867_v23 = vld [vmem:[#allocation2 + $0xb2] sm:$0xff]  ;;  %v295_v24 = vld [vmem:[#allocation2] sm:$0xff] }
  0x4c   : > { %v5869_v25 = vld [vmem:[#allocation2 + $0xc2] sm:$0xff]  ;;  %v5878_v27 = vld [vmem:[#allocation2 + $0xca] sm:$0xff]  ;;  %v5880_v28 = vld [vmem:[#allocation2 + $0x18] sm:$0xff] }
  0x4d   : > { %v296_v26 = vld [vmem:[#allocation2 + $0x8] sm:$0xff]  ;;  %6635 = vst [vmem:[#allocation23_spill] sm:$0xff] %v5880_v28  ;;  %v5882_v29 = vld [vmem:[#allocation2 + $0xda] sm:$0xff]  ;;  %v5898_v39 = vld [vmem:[#allocation2 + $0x30] sm:$0xff] }
  0x4e   : > { %4629 = vmatmul.mubr.msk.f32.gmra.mrb[12].mxu1 %vm169_vm1, %v5721_v50  ;;  %4826 = vmatmul.mubr.msk.f32.gmra.mrb[10].mxu0 %vm169_vm1, %v5721_v50  ;;  %v5892_v31 = vld [vmem:[#allocation2 + $0x20] sm:$0xff]  ;;  %6637 = vst [vmem:[#allocation25_spill] sm:$0xff] %v5898_v39  ;;  %v5900_v40 = vld [vmem:[#allocation2 + $0xf2] sm:$0xff]  ;;  %v5917_v45 = vld [vmem:[#allocation2 + $0x48] sm:$0xff] }
  0x4f   : > { %4631 = vmatprep.mubr.msk.f32.mxu1 %vm169_vm1, %v5723_v51  ;;  %4828 = vmatprep.mubr.msk.f32.mxu0 %vm169_vm1, %v5723_v51  ;;  %6636 = vst [vmem:[#allocation24_spill] sm:$0xff] %v5892_v31  ;;  %v5894_v38 = vld [vmem:[#allocation2 + $0xe2] sm:$0xff]  ;;  %v5913_v42 = vld [vmem:[#allocation2 + $0x38] sm:$0xff]  ;;  %6638 = vst [vmem:[#allocation26_spill] sm:$0xff] %v5917_v45 }
  0x50   : > { %v5915_v44 = vld [vmem:[#allocation2 + $0xfa] sm:$0xff]  ;;  %v5919_v46 = vld [vmem:[#allocation2 + $0x10a] sm:$0xff]  ;;  %v5931_v57 = vld [vmem:[#allocation2 + $0x112] sm:$0xff] }
  0x51   : > { %v5929_v47 = vld [vmem:[#allocation2 + $0x50] sm:$0xff]  ;;  %v5933_v58 = vld [vmem:[#allocation2 + $0x60] sm:$0xff] }
  0x52   : > { %4632 = vmatmul.mubr.msk.f32.gmra.mrb[14].mxu1 %vm169_vm1, %v5733_v52  ;;  %4829 = vmatmul.mubr.msk.f32.gmra.mrb[12].mxu0 %vm169_vm1, %v5733_v52  ;;  %6639 = vst [vmem:[#allocation27_spill] sm:$0xff] %v5929_v47  ;;  %6640 = vst [vmem:[#allocation28_spill] sm:$0xff] %v5933_v58 }
  0x53   : > { %4634 = vmatprep.mubr.msk.f32.mxu1 %vm169_vm1, %v5735_v53  ;;  %4831 = vmatprep.mubr.msk.f32.mxu0 %vm169_vm1, %v5735_v53  ;;  %v6045_v53 = vld [vmem:[#allocation2 + $0x108] sm:$0xff] }
  0x56   : > { %4635 = vmatmul.mubr.msk.f32.gmra.mrb[16].mxu1 %vm169_vm1, %v5745_v54  ;;  %4832 = vmatmul.mubr.msk.f32.gmra.mrb[14].mxu0 %vm169_vm1, %v5745_v54  ;;  %v6023_v54 = vld [vmem:[#allocation2 + $0xe0] sm:$0xff] }
  0x57   : > { %4637 = vmatprep.mubr.msk.f32.mxu1 %vm169_vm1, %v5749_v56  ;;  %4860 = vmatprep.mubr.msk.f32.mxu0 %vm169_vm1, %v5747_v55  ;;  %v6011_v56 = vld [vmem:[#allocation2 + $0x18a] sm:$0xff] }
  0x58   : > { %6650 = vst [vmem:[#allocation38_spill] sm:$0xff] %v6011_v56 }
  0x5a   : > { %4638 = vmatmul.mubr.msk.f32.gmra.mrb[18].mxu1 %vm169_vm1, %v5763_v59  ;;  %4861 = vmatmul.mubr.msk.f32.vlgmr.msra.gmra.mrb[0].mxu0 %vm169_vm1, %v5765_v60  ;;  %v5999_v59 = vld [vmem:[#allocation2 + $0x182] sm:$0xff] }
  0x5b   : > { %4909 = vmatpush3.msk.msra.mxu0 %vm457_vm0, %v5644_v33  ;;  %4640 = vmatprep.mubr.msk.f32.mxu1 %vm169_vm1, %v5768_v62  ;;  %v5997_v62 = vld [vmem:[#allocation2 + $0xc0] sm:$0xff]  ;;  %6649 = vst [vmem:[#allocation37_spill] sm:$0xff] %v5999_v59 }
  0x5c   : > { %4863 = vmatprep.mubr.msk.f32.mxu0 %vm169_vm1, %v5770_v63  ;;  %4958 = vmatprep.subr.msk.mxu0 %vm457_vm0, %v6569_v61  ;;  %v5949_v61 = vld [vmem:[#allocation2 + $0x78] sm:$0xff]  ;;  %6648 = vst [vmem:[#allocation36_spill] sm:$0xff] %v5997_v62 }
  0x5d   : > { %6642 = vst [vmem:[#allocation30_spill] sm:$0xff] %v5949_v61 }
  0x5e   : > { %4641 = vmatmul.mubr.msk.f32.gmra.mrb[20].mxu1 %vm169_vm1, %v5780_v0  ;;  %4864 = vmatmul.mubr.msk.f32.gmra.mrb[2].mxu0 %vm169_vm1, %v5782_v2  ;;  %v5995_v0 = vld [vmem:[#allocation2 + $0x172] sm:$0xff] }
  0x5f   : > { %4643 = vmatprep.mubr.msk.f32.mxu1 %vm169_vm1, %v5786_v3  ;;  %4866 = vmatprep.mubr.msk.f32.mxu0 %vm169_vm1, %v5788_v4  ;;  %v5993_v3 = vld [vmem:[#allocation2 + $0xb0] sm:$0xff]  ;;  %6647 = vst [vmem:[#allocation35_spill] sm:$0xff] %v5995_v0 }
  0x60   : > { %6646 = vst [vmem:[#allocation34_spill] sm:$0xff] %v5993_v3 }
  0x62   : > { %4644 = vmatmul.mubr.msk.f32.gmra.mrb[22].mxu1 %vm169_vm1, %v5801_v5  ;;  %4867 = vmatmul.mubr.msk.f32.gmra.mrb[4].mxu0 %vm169_vm1, %v5803_v6  ;;  %v5983_v5 = vld [vmem:[#allocation2 + $0x16a] sm:$0xff] }
  0x63   : > { %4646 = vmatprep.mubr.msk.f32.mxu1 %vm169_vm1, %v5805_v7  ;;  %4869 = vmatprep.mubr.msk.f32.mxu0 %vm169_vm1, %v5807_v9  ;;  %v5981_v7 = vld [vmem:[#allocation2 + $0xa8] sm:$0xff] }
  0x66   : > { %4647 = vmatmul.mubr.msk.f32.gmra.mrb[24].mxu1 %vm169_vm1, %v5817_v10  ;;  %4870 = vmatmul.mubr.msk.f32.gmra.mrb[6].mxu0 %vm169_vm1, %v5819_v11  ;;  %v5979_v10 = vld [vmem:[#allocation2 + $0x15a] sm:$0xff] }
  0x67   : > { %4649 = vmatprep.mubr.msk.f32.mxu1 %vm169_vm1, %v5821_v12  ;;  %4872 = vmatprep.mubr.msk.f32.mxu0 %vm169_vm1, %v5823_v13  ;;  %v5977_v12 = vld [vmem:[#allocation2 + $0x98] sm:$0xff] }
  0x68   : > { %6645 = vst [vmem:[#allocation33_spill] sm:$0xff] %v5977_v12 }
  0x6a   : > { %4650 = vmatmul.mubr.msk.f32.gmra.mrb[26].mxu1 %vm169_vm1, %v5833_v14  ;;  %4873 = vmatmul.mubr.msk.f32.gmra.mrb[8].mxu0 %vm169_vm1, %v5835_v15  ;;  %v5967_v14 = vld [vmem:[#allocation2 + $0x152] sm:$0xff] }
  0x6b   : > { %4652 = vmatprep.mubr.msk.f32.mxu1 %vm169_vm1, %v5837_v16  ;;  %4875 = vmatprep.mubr.msk.f32.mxu0 %vm169_vm1, %v5839_v17  ;;  %v5965_v16 = vld [vmem:[#allocation2 + $0x90] sm:$0xff] }
  0x6c   : > { %6644 = vst [vmem:[#allocation32_spill] sm:$0xff] %v5965_v16 }
  0x6e   : > { %4653 = vmatmul.mubr.msk.f32.gmra.mrb[28].mxu1 %vm169_vm1, %v5849_v18  ;;  %4876 = vmatmul.mubr.msk.f32.gmra.mrb[10].mxu0 %vm169_vm1, %v5851_v19  ;;  %v5963_v18 = vld [vmem:[#allocation2 + $0x142] sm:$0xff] }
  0x6f   : > { %4655 = vmatprep.mubr.msk.f32.mxu1 %vm169_vm1, %v5853_v20  ;;  %4878 = vmatprep.mubr.msk.f32.mxu0 %vm169_vm1, %v5855_v21  ;;  %v5961_v20 = vld [vmem:[#allocation2 + $0x80] sm:$0xff] }
  0x70   : > { %6643 = vst [vmem:[#allocation31_spill] sm:$0xff] %v5961_v20 }
  0x72   : > { %4656 = vmatmul.mubr.msk.f32.gmra.mrb[30].mxu1 %vm169_vm1, %v5865_v22  ;;  %4879 = vmatmul.mubr.msk.f32.gmra.mrb[12].mxu0 %vm169_vm1, %v5867_v23  ;;  %v5951_v22 = vld [vmem:[#allocation2 + $0x13a] sm:$0xff] }
  0x73   : > { %4660 = vmatprep.mubr.msk.f32.mxu1 %vm169_vm1, %v295_v24  ;;  %4881 = vmatprep.mubr.msk.f32.mxu0 %vm169_vm1, %v5869_v25  ;;  %v5935_v24 = vld [vmem:[#allocation2 + $0x122] sm:$0xff] }
  0x76   : > { %4661 = vmatmul.mubr.msk.f32.vlgmr.msra.gmra.mrb[0].mxu1 %vm169_vm1, %v296_v26  ;;  %4882 = vmatmul.mubr.msk.f32.gmra.mrb[14].mxu0 %vm169_vm1, %v5878_v27  ;;  %v5945_v26 = vld [vmem:[#allocation2 + $0x68] sm:$0xff] }
  0x77   : > { %4663 = vmatprep.mubr.msk.f32.mxu1 %vm169_vm1, %v5880_v28  ;;  %4884 = vmatprep.mubr.msk.f32.mxu0 %vm169_vm1, %v5882_v29  ;;  %6641 = vst [vmem:[#allocation29_spill] sm:$0xff] %v5945_v26  ;;  %v6013_v28 = vld [vmem:[#allocation2 + $0xd8] sm:$0xff] }
  0x78   : > { %4709 = vmatpush3.msk.msra.mxu1 %vm457_vm0, %v5588_v8 }
  0x79   : > { %4758 = vmatprep.subr.msk.mxu1 %vm457_vm0, %v6568_v30  ;;  %v5947_v30 = vld [vmem:[#allocation2 + $0x12a] sm:$0xff] }
  0x7a   : > { %4664 = vmatmul.mubr.msk.f32.gmra.mrb[2].mxu1 %vm169_vm1, %v5892_v31  ;;  %4885 = vmatmul.mubr.msk.f32.gmra.mrb[16].mxu0 %vm169_vm1, %v5894_v38  ;;  %v6009_v31 = vld [vmem:[#allocation2 + $0xc8] sm:$0xff] }
  0x7b   : > { %4666 = vmatprep.mubr.msk.f32.mxu1 %vm169_vm1, %v5898_v39  ;;  %4887 = vmatprep.mubr.msk.f32.mxu0 %vm169_vm1, %v5900_v40 }
  0x7e   : > { %4667 = vmatmul.mubr.msk.f32.gmra.mrb[4].mxu1 %vm169_vm1, %v5913_v42  ;;  %4888 = vmatmul.mubr.msk.f32.gmra.mrb[18].mxu0 %vm169_vm1, %v5915_v44 }
  0x7f   : > { %4669 = vmatprep.mubr.msk.f32.mxu1 %vm169_vm1, %v5917_v45  ;;  %4890 = vmatprep.mubr.msk.f32.mxu0 %vm169_vm1, %v5919_v46 }
  0x82   : > { %4670 = vmatmul.mubr.msk.f32.gmra.mrb[6].mxu1 %vm169_vm1, %v5929_v47  ;;  %4891 = vmatmul.mubr.msk.f32.gmra.mrb[20].mxu0 %vm169_vm1, %v5931_v57 }
  0x83   : > { %4672 = vmatprep.mubr.msk.f32.mxu1 %vm169_vm1, %v5933_v58  ;;  %4893 = vmatprep.mubr.msk.f32.mxu0 %vm169_vm1, %v5935_v24 }
  0x86   : > { %4673 = vmatmul.mubr.msk.f32.gmra.mrb[8].mxu1 %vm169_vm1, %v5945_v26  ;;  %4894 = vmatmul.mubr.msk.f32.gmra.mrb[22].mxu0 %vm169_vm1, %v5947_v30 }
  0x87   : > { %4675 = vmatprep.mubr.msk.f32.mxu1 %vm169_vm1, %v5949_v61  ;;  %4896 = vmatprep.mubr.msk.f32.mxu0 %vm169_vm1, %v5951_v22 }
  0x8a   : > { %4676 = vmatmul.mubr.msk.f32.gmra.mrb[10].mxu1 %vm169_vm1, %v5961_v20  ;;  %4897 = vmatmul.mubr.msk.f32.gmra.mrb[24].mxu0 %vm169_vm1, %v5963_v18 }
  0x8b   : > { %4678 = vmatprep.mubr.msk.f32.mxu1 %vm169_vm1, %v5965_v16  ;;  %4899 = vmatprep.mubr.msk.f32.mxu0 %vm169_vm1, %v5967_v14 }
  0x8e   : > { %4679 = vmatmul.mubr.msk.f32.gmra.mrb[12].mxu1 %vm169_vm1, %v5977_v12  ;;  %4900 = vmatmul.mubr.msk.f32.gmra.mrb[26].mxu0 %vm169_vm1, %v5979_v10 }
  0x8f   : > { %4681 = vmatprep.mubr.msk.f32.mxu1 %vm169_vm1, %v5981_v7  ;;  %4902 = vmatprep.mubr.msk.f32.mxu0 %vm169_vm1, %v5983_v5 }
  0x92   : > { %4682 = vmatmul.mubr.msk.f32.gmra.mrb[14].mxu1 %vm169_vm1, %v5993_v3  ;;  %4903 = vmatmul.mubr.msk.f32.gmra.mrb[28].mxu0 %vm169_vm1, %v5995_v0  ;;  %v6030_v0 = vld [vmem:[%s6565_s1 + $0x20] sm:$0xf] }
  0x93   : > { %4684 = vmatprep.mubr.msk.f32.mxu1 %vm169_vm1, %v5997_v62  ;;  %4905 = vmatprep.mubr.msk.f32.mxu0 %vm169_vm1, %v5999_v59  ;;  %v6025_v59 = vld [vmem:[#allocation2 + $0xf0] sm:$0xff] }
  0x96   : > { %4685 = vmatmul.mubr.msk.f32.gmra.mrb[16].mxu1 %vm169_vm1, %v6009_v31  ;;  %4906 = vmatmul.mubr.msk.f32.gmra.mrb[30].mxu0 %vm169_vm1, %v6011_v56  ;;  %v6651_v56 = vrot.slane %v5644_v33, 4  ;;  %v6057_v33 = vld [vmem:[#allocation2 + $0x110] sm:$0xff] }
  0x97   : > { %4687 = vmatprep.mubr.msk.f32.mxu1 %vm169_vm1, %v6013_v28  ;;  %4910 = vmatprep.mubr.msk.f32.mxu0 %vm169_vm1, %v5898_v39  ;;  %v6041_v39 = vld [vmem:[#allocation2 + $0xf8] sm:$0xff] }
  0x9a   : > { %4688 = vmatmul.mubr.msk.f32.gmra.mrb[18].mxu1 %vm169_vm1, %v6023_v54  ;;  %4911 = vmatmul.mubr.msk.f32.vlgmr.msra.gmra.mrb[0].mxu0 %vm169_vm1, %v5913_v42 }
  0x9b   : > { %4959 = vmatpush3.msk.msra.mxu0 %vm457_vm0, %v6651_v56  ;;  %4690 = vmatprep.mubr.msk.f32.mxu1 %vm169_vm1, %v6025_v59  ;;  %v6059_v56 = vld [vmem:[#allocation2 + $0x120] sm:$0xff] }
  0x9c   : > { %4913 = vmatprep.mubr.msk.f32.mxu0 %vm169_vm1, %v5917_v45  ;;  %5008 = vmatprep.subr.msk.mxu0 %vm457_vm0, %v6030_v0  ;;  %v6071_v45 = vld [vmem:[#allocation2 + $0x138] sm:$0xff] }
  0x9e   : > { %4691 = vmatmul.mubr.msk.f32.gmra.mrb[20].mxu1 %vm169_vm1, %v6041_v39  ;;  %4914 = vmatmul.mubr.msk.f32.gmra.mrb[2].mxu0 %vm169_vm1, %v5929_v47  ;;  %v6069_v47 = vld [vmem:[#allocation2 + $0x128] sm:$0xff] }
  0x9f   : > { %4693 = vmatprep.mubr.msk.f32.mxu1 %vm169_vm1, %v6045_v53  ;;  %4916 = vmatprep.mubr.msk.f32.mxu0 %vm169_vm1, %v5933_v58  ;;  %v6083_v58 = vld [vmem:[#allocation2 + $0x150] sm:$0xff] }
  0xa2   : > { %4694 = vmatmul.mubr.msk.f32.gmra.mrb[22].mxu1 %vm169_vm1, %v6057_v33  ;;  %4917 = vmatmul.mubr.msk.f32.gmra.mrb[4].mxu0 %vm169_vm1, %v5945_v26  ;;  %v6081_v26 = vld [vmem:[#allocation2 + $0x140] sm:$0xff] }
  0xa3   : > { %4696 = vmatprep.mubr.msk.f32.mxu1 %vm169_vm1, %v6059_v56  ;;  %4919 = vmatprep.mubr.msk.f32.mxu0 %vm169_vm1, %v5949_v61  ;;  %v6095_v61 = vld [vmem:[#allocation2 + $0x168] sm:$0xff] }
  0xa6   : > { %4697 = vmatmul.mubr.msk.f32.gmra.mrb[24].mxu1 %vm169_vm1, %v6069_v47  ;;  %4920 = vmatmul.mubr.msk.f32.gmra.mrb[6].mxu0 %vm169_vm1, %v5961_v20  ;;  %v6093_v20 = vld [vmem:[#allocation2 + $0x158] sm:$0xff] }
  0xa7   : > { %4699 = vmatprep.mubr.msk.f32.mxu1 %vm169_vm1, %v6071_v45  ;;  %4922 = vmatprep.mubr.msk.f32.mxu0 %vm169_vm1, %v5965_v16  ;;  %v1008_v16 = vld [vmem:[#allocation2 + $0x2] sm:$0xff] }
  0xaa   : > { %4700 = vmatmul.mubr.msk.f32.gmra.mrb[26].mxu1 %vm169_vm1, %v6081_v26  ;;  %4923 = vmatmul.mubr.msk.f32.gmra.mrb[8].mxu0 %vm169_vm1, %v5977_v12  ;;  %v6105_v12 = vld [vmem:[#allocation2 + $0x170] sm:$0xff] }
  0xab   : > { %4702 = vmatprep.mubr.msk.f32.mxu1 %vm169_vm1, %v6083_v58  ;;  %4925 = vmatprep.mubr.msk.f32.mxu0 %vm169_vm1, %v5981_v7 }
  0xae   : > { %4703 = vmatmul.mubr.msk.f32.gmra.mrb[28].mxu1 %vm169_vm1, %v6093_v20  ;;  %4926 = vmatmul.mubr.msk.f32.gmra.mrb[10].mxu0 %vm169_vm1, %v5993_v3  ;;  %v1009_v3 = vld [vmem:[#allocation2 + $0xa] sm:$0xff] }
  0xaf   : > { %4705 = vmatprep.mubr.msk.f32.mxu1 %vm169_vm1, %v6095_v61  ;;  %4928 = vmatprep.mubr.msk.f32.mxu0 %vm169_vm1, %v5997_v62  ;;  %v6652_v62 = vrot.slane %v5588_v8, 4  ;;  %v6166_v8 = vld [vmem:[#allocation2 + $0x180] sm:$0xff] }
  0xb2   : > { %4706 = vmatmul.mubr.msk.f32.gmra.mrb[30].mxu1 %vm169_vm1, %v6105_v12  ;;  %4929 = vmatmul.mubr.msk.f32.gmra.mrb[12].mxu0 %vm169_vm1, %v6009_v31 }
  0xb3   : > { %4710 = vmatprep.mubr.msk.f32.mxu1 %vm169_vm1, %v1008_v16  ;;  %4931 = vmatprep.mubr.msk.f32.mxu0 %vm169_vm1, %v6013_v28  ;;  %v6667_v16 = vld [vmem:[#allocation28_spill] sm:$0xff] }
  0xb6   : > { %4711 = vmatmul.mubr.msk.f32.vlgmr.msra.gmra.mrb[0].mxu1 %vm169_vm1, %v1009_v3  ;;  %4932 = vmatmul.mubr.msk.f32.gmra.mrb[14].mxu0 %vm169_vm1, %v6023_v54  ;;  %v6666_v3 = vld [vmem:[#allocation14_spill] sm:$0xff] }
  0xb7   : > { %4713 = vmatprep.mubr.msk.f32.mxu1 %vm169_vm1, %v5747_v55  ;;  %4934 = vmatprep.mubr.msk.f32.mxu0 %vm169_vm1, %v6025_v59  ;;  %v6176_v55 = vld [vmem:[#allocation2 + $0x188] sm:$0xff] }
  0xb8   : > { %4759 = vmatpush3.msk.msra.mxu1 %vm457_vm0, %v6652_v62  ;;  %v2592_v62 = vld [vmem:[#allocation2 + $0x1a0] sm:$0xff] }
  0xb9   : > { %5058 = vmatprep.subr.msk.mxu1 %vm457_vm0, %v5502_v1 }
  0xba   : > { %4714 = vmatmul.mubr.msk.f32.gmra.mrb[2].mxu1 %vm169_vm1, %v5765_v60  ;;  %4935 = vmatmul.mubr.msk.f32.gmra.mrb[16].mxu0 %vm169_vm1, %v6041_v39  ;;  %v2591_v60 = vld [vmem:[#allocation2 + $0x198] sm:$0xff] }
  0xbb   : > { %4716 = vmatprep.mubr.msk.f32.mxu1 %vm169_vm1, %v5770_v63  ;;  %4937 = vmatprep.mubr.msk.f32.mxu0 %vm169_vm1, %v6045_v53 }
  0xbe   : > { %4717 = vmatmul.mubr.msk.f32.gmra.mrb[4].mxu1 %vm169_vm1, %v5782_v2  ;;  %4938 = vmatmul.mubr.msk.f32.gmra.mrb[18].mxu0 %vm169_vm1, %v6057_v33 }
  0xbf   : > { %4719 = vmatprep.mubr.msk.f32.mxu1 %vm169_vm1, %v5788_v4  ;;  %4940 = vmatprep.mubr.msk.f32.mxu0 %vm169_vm1, %v6059_v56 }
  0xc2   : > { %4720 = vmatmul.mubr.msk.f32.gmra.mrb[6].mxu1 %vm169_vm1, %v5803_v6  ;;  %4941 = vmatmul.mubr.msk.f32.gmra.mrb[20].mxu0 %vm169_vm1, %v6069_v47 }
  0xc3   : > { %4722 = vmatprep.mubr.msk.f32.mxu1 %vm169_vm1, %v5807_v9  ;;  %4943 = vmatprep.mubr.msk.f32.mxu0 %vm169_vm1, %v6071_v45 }
  0xc6   : > { %4723 = vmatmul.mubr.msk.f32.gmra.mrb[8].mxu1 %vm169_vm1, %v5819_v11  ;;  %4944 = vmatmul.mubr.msk.f32.gmra.mrb[22].mxu0 %vm169_vm1, %v6081_v26 }
  0xc7   : > { %4725 = vmatprep.mubr.msk.f32.mxu1 %vm169_vm1, %v5823_v13  ;;  %4946 = vmatprep.mubr.msk.f32.mxu0 %vm169_vm1, %v6083_v58 }
  0xca   : > { %4726 = vmatmul.mubr.msk.f32.gmra.mrb[10].mxu1 %vm169_vm1, %v5835_v15  ;;  %4947 = vmatmul.mubr.msk.f32.gmra.mrb[24].mxu0 %vm169_vm1, %v6093_v20 }
  0xcb   : > { %4728 = vmatprep.mubr.msk.f32.mxu1 %vm169_vm1, %v5839_v17  ;;  %4949 = vmatprep.mubr.msk.f32.mxu0 %vm169_vm1, %v6095_v61 }
  0xce   : > { %4729 = vmatmul.mubr.msk.f32.gmra.mrb[12].mxu1 %vm169_vm1, %v5851_v19  ;;  %4950 = vmatmul.mubr.msk.f32.gmra.mrb[26].mxu0 %vm169_vm1, %v6105_v12 }
  0xcf   : > { %4731 = vmatprep.mubr.msk.f32.mxu1 %vm169_vm1, %v5855_v21  ;;  %4952 = vmatprep.mubr.msk.f32.mxu0 %vm169_vm1, %v6166_v8 }
  0xd2   : > { %4732 = vmatmul.mubr.msk.f32.gmra.mrb[14].mxu1 %vm169_vm1, %v5867_v23  ;;  %4953 = vmatmul.mubr.msk.f32.gmra.mrb[28].mxu0 %vm169_vm1, %v6176_v55 }
  0xd3   : > { %4734 = vmatprep.mubr.msk.f32.mxu1 %vm169_vm1, %v5869_v25  ;;  %4955 = vmatprep.mubr.msk.f32.mxu0 %vm169_vm1, %v2591_v60  ;;  %v6670_v60 = vld [vmem:[#allocation16_spill] sm:$0xff] }
  0xd6   : > { %4735 = vmatmul.mubr.msk.f32.gmra.mrb[16].mxu1 %vm169_vm1, %v5878_v27  ;;  %4956 = vmatmul.mubr.msk.f32.gmra.mrb[30].mxu0 %vm169_vm1, %v2592_v62  ;;  %v6671_v62 = vld [vmem:[#allocation30_spill] sm:$0xff] }
  0xd7   : > { %4737 = vmatprep.mubr.msk.f32.mxu1 %vm169_vm1, %v5882_v29  ;;  %4960 = vmatprep.mubr.msk.f32.mxu0 %vm169_vm1, %v5634_v32  ;;  %v6653_v32 = vld [vmem:[#allocation7_spill] sm:$0xff] }
  0xda   : > { %4738 = vmatmul.mubr.msk.f32.gmra.mrb[18].mxu1 %vm169_vm1, %v5894_v38  ;;  %4961 = vmatmul.mubr.msk.f32.vlgmr.msra.gmra.mrb[0].mxu0 %vm169_vm1, %v5653_v34  ;;  %v6654_v34 = vld [vmem:[#allocation35_spill] sm:$0xff] }
  0xdb   : > { %5009 = vmatpush3.msk.msra.mxu0 %vm457_vm0, %v6030_v0  ;;  %4740 = vmatprep.mubr.msk.f32.mxu1 %vm169_vm1, %v5900_v40  ;;  %v6665_v0 = vld [vmem:[#allocation27_spill] sm:$0xff] }
  0xdc   : > { %4963 = vmatprep.mubr.msk.f32.mxu0 %vm169_vm1, %v5657_v35  ;;  %v6655_v35 = vld [vmem:[#allocation8_spill] sm:$0xff] }
  0xde   : > { %4741 = vmatmul.mubr.msk.f32.gmra.mrb[20].mxu1 %vm169_vm1, %v5915_v44  ;;  %4964 = vmatmul.mubr.msk.f32.gmra.mrb[2].mxu0 %vm169_vm1, %v5669_v36  ;;  %v6656_v36 = vld [vmem:[#allocation23_spill] sm:$0xff] }
  0xdf   : > { %4743 = vmatprep.mubr.msk.f32.mxu1 %vm169_vm1, %v5919_v46  ;;  %4966 = vmatprep.mubr.msk.f32.mxu0 %vm169_vm1, %v5671_v37  ;;  %v6657_v37 = vld [vmem:[#allocation9_spill] sm:$0xff] }
  0xe2   : > { %4744 = vmatmul.mubr.msk.f32.gmra.mrb[22].mxu1 %vm169_vm1, %v5931_v57  ;;  %4967 = vmatmul.mubr.msk.f32.gmra.mrb[4].mxu0 %vm169_vm1, %v5685_v41  ;;  %v6658_v41 = vld [vmem:[#allocation24_spill] sm:$0xff] }
  0xe3   : > { %4746 = vmatprep.mubr.msk.f32.mxu1 %vm169_vm1, %v5935_v24  ;;  %4969 = vmatprep.mubr.msk.f32.mxu0 %vm169_vm1, %v5690_v43  ;;  %v6659_v43 = vld [vmem:[#allocation10_spill] sm:$0xff] }
  0xe6   : > { %4747 = vmatmul.mubr.msk.f32.gmra.mrb[24].mxu1 %vm169_vm1, %v5947_v30  ;;  %4970 = vmatmul.mubr.msk.f32.gmra.mrb[6].mxu0 %vm169_vm1, %v5708_v48  ;;  %v6660_v48 = vld [vmem:[#allocation25_spill] sm:$0xff] }
  0xe7   : > { %4749 = vmatprep.mubr.msk.f32.mxu1 %vm169_vm1, %v5951_v22  ;;  %4972 = vmatprep.mubr.msk.f32.mxu0 %vm169_vm1, %v5711_v49  ;;  %v6661_v49 = vld [vmem:[#allocation11_spill] sm:$0xff] }
  0xea   : > { %4750 = vmatmul.mubr.msk.f32.gmra.mrb[26].mxu1 %vm169_vm1, %v5963_v18  ;;  %4973 = vmatmul.mubr.msk.f32.gmra.mrb[8].mxu0 %vm169_vm1, %v5721_v50  ;;  %v6662_v50 = vld [vmem:[#allocation12_spill] sm:$0xff] }
  0xeb   : > { %4752 = vmatprep.mubr.msk.f32.mxu1 %vm169_vm1, %v5967_v14  ;;  %4975 = vmatprep.mubr.msk.f32.mxu0 %vm169_vm1, %v5723_v51  ;;  %v6663_v51 = vld [vmem:[#allocation26_spill] sm:$0xff] }
  0xee   : > { %4753 = vmatmul.mubr.msk.f32.gmra.mrb[28].mxu1 %vm169_vm1, %v5979_v10  ;;  %4976 = vmatmul.mubr.msk.f32.gmra.mrb[10].mxu0 %vm169_vm1, %v5733_v52  ;;  %v6664_v52 = vld [vmem:[#allocation13_spill] sm:$0xff] }
  0xef   : > { %4755 = vmatprep.mubr.msk.f32.mxu1 %vm169_vm1, %v5983_v5  ;;  %4978 = vmatprep.mubr.msk.f32.mxu0 %vm169_vm1, %v6653_v32  ;;  %v6672_v32 = vld [vmem:[#allocation17_spill] sm:$0xff] }
  0xf2   : > { %4756 = vmatmul.mubr.msk.f32.gmra.mrb[30].mxu1 %vm169_vm1, %v6654_v34  ;;  %4979 = vmatmul.mubr.msk.f32.gmra.mrb[12].mxu0 %vm169_vm1, %v6655_v35  ;;  %v6673_v35 = vld [vmem:[#allocation31_spill] sm:$0xff] }
  0xf3   : > { %4760 = vmatprep.mubr.msk.f32.mxu1 %vm169_vm1, %v6656_v36  ;;  %4981 = vmatprep.mubr.msk.f32.mxu0 %vm169_vm1, %v6657_v37  ;;  %v6674_v36 = vld [vmem:[#allocation18_spill] sm:$0xff] }
  0xf6   : > { %4761 = vmatmul.mubr.msk.f32.vlgmr.msra.gmra.mrb[0].mxu1 %vm169_vm1, %v6658_v41  ;;  %4982 = vmatmul.mubr.msk.f32.gmra.mrb[14].mxu0 %vm169_vm1, %v6659_v43  ;;  %v6675_v41 = vld [vmem:[#allocation32_spill] sm:$0xff] }
  0xf7   : > { %4763 = vmatprep.mubr.msk.f32.mxu1 %vm169_vm1, %v6660_v48  ;;  %4984 = vmatprep.mubr.msk.f32.mxu0 %vm169_vm1, %v6661_v49  ;;  %v6676_v48 = vld [vmem:[#allocation19_spill] sm:$0xff] }
  0xf8   : > { %5059 = vmatpush3.msk.msra.mxu1 %vm457_vm0, %v5502_v1  ;;  %v6668_v1 = vld [vmem:[#allocation15_spill] sm:$0xff] }
  0xfa   : > { %4764 = vmatmul.mubr.msk.f32.gmra.mrb[2].mxu1 %vm169_vm1, %v5913_v42  ;;  %4985 = vmatmul.mubr.msk.f32.gmra.mrb[16].mxu0 %vm169_vm1, %v6662_v50  ;;  %v6669_v42 = vld [vmem:[#allocation29_spill] sm:$0xff] }
  0xfb   : > { %4766 = vmatprep.mubr.msk.f32.mxu1 %vm169_vm1, %v6663_v51  ;;  %4987 = vmatprep.mubr.msk.f32.mxu0 %vm169_vm1, %v6664_v52  ;;  %v6677_v51 = vld [vmem:[#allocation33_spill] sm:$0xff] }
  0xfe   : > { %4767 = vmatmul.mubr.msk.f32.gmra.mrb[4].mxu1 %vm169_vm1, %v6665_v0  ;;  %4988 = vmatmul.mubr.msk.f32.gmra.mrb[18].mxu0 %vm169_vm1, %v6666_v3  ;;  %v6678_v0 = vld [vmem:[#allocation20_spill] sm:$0xff] }
  0xff   : > { %4769 = vmatprep.mubr.msk.f32.mxu1 %vm169_vm1, %v6667_v16  ;;  %4990 = vmatprep.mubr.msk.f32.mxu0 %vm169_vm1, %v6668_v1  ;;  %v6679_v16 = vld [vmem:[#allocation21_spill] sm:$0xff] }
 0x102   : > { %4770 = vmatmul.mubr.msk.f32.gmra.mrb[6].mxu1 %vm169_vm1, %v6669_v42  ;;  %4991 = vmatmul.mubr.msk.f32.gmra.mrb[20].mxu0 %vm169_vm1, %v6670_v60  ;;  %v6300_v42 = vld [vmem:[#allocation2 + $0x181] sm:$0xff] }
 0x103   : > { %4772 = vmatprep.mubr.msk.f32.mxu1 %vm169_vm1, %v6671_v62  ;;  %4993 = vmatprep.mubr.msk.f32.mxu0 %vm169_vm1, %v6672_v32  ;;  %v6680_v62 = vld [vmem:[#allocation34_spill] sm:$0xff] }
 0x106   : > { %4773 = vmatmul.mubr.msk.f32.gmra.mrb[8].mxu1 %vm169_vm1, %v6673_v35  ;;  %4994 = vmatmul.mubr.msk.f32.gmra.mrb[22].mxu0 %vm169_vm1, %v6674_v36  ;;  %v6681_v35 = vld [vmem:[#allocation22_spill] sm:$0xff] }
 0x107   : > { %4775 = vmatprep.mubr.msk.f32.mxu1 %vm169_vm1, %v6675_v41  ;;  %4996 = vmatprep.mubr.msk.f32.mxu0 %vm169_vm1, %v6676_v48  ;;  %v6682_v41 = vld [vmem:[#allocation36_spill] sm:$0xff] }
 0x10a   : > { %4776 = vmatmul.mubr.msk.f32.gmra.mrb[10].mxu1 %vm169_vm1, %v6677_v51  ;;  %4997 = vmatmul.mubr.msk.f32.gmra.mrb[24].mxu0 %vm169_vm1, %v6678_v0  ;;  %v6310_v51 = vld [vmem:[#allocation2 + $0x189] sm:$0xff] }
 0x10b   : > { %4778 = vmatprep.mubr.msk.f32.mxu1 %vm169_vm1, %v5981_v7  ;;  %4999 = vmatprep.mubr.msk.f32.mxu0 %vm169_vm1, %v6679_v16  ;;  %v2979_v7 = vld [vmem:[#allocation2 + $0x199] sm:$0xff] }
 0x10e   : > { %4779 = vmatmul.mubr.msk.f32.gmra.mrb[12].mxu1 %vm169_vm1, %v6680_v62  ;;  %5000 = vmatmul.mubr.msk.f32.gmra.mrb[26].mxu0 %vm169_vm1, %v6681_v35  ;;  %v2980_v62 = vld [vmem:[#allocation2 + $0x1a1] sm:$0xff] }
 0x10f   : > { %4781 = vmatprep.mubr.msk.f32.mxu1 %vm169_vm1, %v6682_v41  ;;  %5002 = vmatprep.mubr.msk.f32.mxu0 %vm169_vm1, %v6300_v42 }
 0x112   : > { %4782 = vmatmul.mubr.msk.f32.gmra.mrb[14].mxu1 %vm169_vm1, %v6009_v31  ;;  %5003 = vmatmul.mubr.msk.f32.gmra.mrb[28].mxu0 %vm169_vm1, %v6310_v51 }
 0x113   : > { %4784 = vmatprep.mubr.msk.f32.mxu1 %vm169_vm1, %v6013_v28  ;;  %5005 = vmatprep.mubr.msk.f32.mxu0 %vm169_vm1, %v2979_v7 }
 0x116   : > { %4785 = vmatmul.mubr.msk.f32.gmra.mrb[16].mxu1 %vm169_vm1, %v6023_v54  ;;  %5006 = vmatmul.mubr.msk.f32.gmra.mrb[30].mxu0 %vm169_vm1, %v2980_v62  ;;  %v3367_v54 = vld [vmem:[#allocation2 + $0x19a] sm:$0xff] }
 0x117   : > { %4787 = vmatprep.mubr.msk.f32.mxu1 %vm169_vm1, %v6025_v59  ;;  %5010 = vmatprep.mubr.msk.f32.mxu0 %vm169_vm1, %v5770_v63  ;;  %v6684_v59 = vld [vmem:[#allocation38_spill] sm:$0xff] }
 0x11a   : > { %4788 = vmatmul.mubr.msk.f32.gmra.mrb[18].mxu1 %vm169_vm1, %v6041_v39  ;;  %5011 = vmatmul.mubr.msk.f32.vlgmr.msra.gmra.mrb[0].mxu0 %vm169_vm1, %v5782_v2 }
 0x11b   : > { %4790 = vmatprep.mubr.msk.f32.mxu1 %vm169_vm1, %v6045_v53  ;;  %5013 = vmatprep.mubr.msk.f32.mxu0 %vm169_vm1, %v5788_v4  ;;  %v6683_v53 = vld [vmem:[#allocation37_spill] sm:$0xff] }
 0x11e   : > { %4791 = vmatmul.mubr.msk.f32.gmra.mrb[20].mxu1 %vm169_vm1, %v6057_v33  ;;  %5014 = vmatmul.mubr.msk.f32.gmra.mrb[2].mxu0 %vm169_vm1, %v5803_v6 }
 0x11f   : > { %4793 = vmatprep.mubr.msk.f32.mxu1 %vm169_vm1, %v6059_v56  ;;  %5016 = vmatprep.mubr.msk.f32.mxu0 %vm169_vm1, %v5807_v9 }
 0x122   : > { %4794 = vmatmul.mubr.msk.f32.gmra.mrb[22].mxu1 %vm169_vm1, %v6069_v47  ;;  %5017 = vmatmul.mubr.msk.f32.gmra.mrb[4].mxu0 %vm169_vm1, %v5819_v11 }
 0x123   : > { %4796 = vmatprep.mubr.msk.f32.mxu1 %vm169_vm1, %v6071_v45  ;;  %5019 = vmatprep.mubr.msk.f32.mxu0 %vm169_vm1, %v5823_v13 }
 0x126   : > { %4797 = vmatmul.mubr.msk.f32.gmra.mrb[24].mxu1 %vm169_vm1, %v6081_v26  ;;  %5020 = vmatmul.mubr.msk.f32.gmra.mrb[6].mxu0 %vm169_vm1, %v5835_v15 }
 0x127   : > { %4799 = vmatprep.mubr.msk.f32.mxu1 %vm169_vm1, %v6083_v58  ;;  %5022 = vmatprep.mubr.msk.f32.mxu0 %vm169_vm1, %v5839_v17 }
 0x12a   : > { %4800 = vmatmul.mubr.msk.f32.gmra.mrb[26].mxu1 %vm169_vm1, %v6093_v20  ;;  %5023 = vmatmul.mubr.msk.f32.gmra.mrb[8].mxu0 %vm169_vm1, %v5851_v19 }
 0x12b   : > { %4802 = vmatprep.mubr.msk.f32.mxu1 %vm169_vm1, %v6095_v61  ;;  %5025 = vmatprep.mubr.msk.f32.mxu0 %vm169_vm1, %v5855_v21  ;;  %v3368_v61 = vld [vmem:[#allocation2 + $0x1a2] sm:$0xff] }
 0x12e   : > { %4803 = vmatmul.mubr.msk.f32.gmra.mrb[28].mxu1 %vm169_vm1, %v6105_v12  ;;  %5026 = vmatmul.mubr.msk.f32.gmra.mrb[10].mxu0 %vm169_vm1, %v5867_v23 }
 0x12f   : > { %4805 = vmatprep.mubr.msk.f32.mxu1 %vm169_vm1, %v6166_v8  ;;  %5028 = vmatprep.mubr.msk.f32.mxu0 %vm169_vm1, %v5869_v25 }
 0x132   : > { %4806 = vmatmul.mubr.msk.f32.gmra.mrb[30].mxu1 %vm169_vm1, %v6176_v55  ;;  %5029 = vmatmul.mubr.msk.f32.gmra.mrb[12].mxu0 %vm169_vm1, %v5878_v27 }
 0x133   : > { %4834 = vmatprep.mubr.msk.f32.mxu1 %vm169_vm1, %v6657_v37  ;;  %5031 = vmatprep.mubr.msk.f32.mxu0 %vm169_vm1, %v5882_v29 }
 0x136   : > { %4835 = vmatmul.mubr.msk.f32.vlgmr.msra.gmra.mrb[16].mxu1 %vm169_vm1, %v6659_v43  ;;  %5032 = vmatmul.mubr.msk.f32.gmra.mrb[14].mxu0 %vm169_vm1, %v5894_v38 }
 0x137   : > { %4837 = vmatprep.mubr.msk.f32.mxu1 %vm169_vm1, %v6661_v49  ;;  %5034 = vmatprep.mubr.msk.f32.mxu0 %vm169_vm1, %v5900_v40 }
 0x13a   : > { %4838 = vmatmul.mubr.msk.f32.gmra.mrb[18].mxu1 %vm169_vm1, %v6662_v50  ;;  %5035 = vmatmul.mubr.msk.f32.gmra.mrb[16].mxu0 %vm169_vm1, %v5915_v44 }
 0x13b   : > { %4840 = vmatprep.mubr.msk.f32.mxu1 %vm169_vm1, %v6664_v52  ;;  %5037 = vmatprep.mubr.msk.f32.mxu0 %vm169_vm1, %v5919_v46 }
 0x13e   : > { %4841 = vmatmul.mubr.msk.f32.gmra.mrb[20].mxu1 %vm169_vm1, %v6666_v3  ;;  %5038 = vmatmul.mubr.msk.f32.gmra.mrb[18].mxu0 %vm169_vm1, %v5931_v57 }
 0x13f   : > { %4843 = vmatprep.mubr.msk.f32.mxu1 %vm169_vm1, %v6668_v1  ;;  %5040 = vmatprep.mubr.msk.f32.mxu0 %vm169_vm1, %v5935_v24 }
 0x142   : > { %4844 = vmatmul.mubr.msk.f32.gmra.mrb[22].mxu1 %vm169_vm1, %v6670_v60  ;;  %5041 = vmatmul.mubr.msk.f32.gmra.mrb[20].mxu0 %vm169_vm1, %v5947_v30 }
 0x143   : > { %4846 = vmatprep.mubr.msk.f32.mxu1 %vm169_vm1, %v6672_v32  ;;  %5043 = vmatprep.mubr.msk.f32.mxu0 %vm169_vm1, %v5951_v22  ;;  %v6459_v22 = vld [vmem:[%s6566_s2] ss:$0 sm:$0xff] }
 0x146   : > { %4847 = vmatmul.mubr.msk.f32.gmra.mrb[24].mxu1 %vm169_vm1, %v6674_v36  ;;  %5044 = vmatmul.mubr.msk.f32.gmra.mrb[22].mxu0 %vm169_vm1, %v5963_v18 }
 0x147   : > { %4849 = vmatprep.mubr.msk.f32.mxu1 %vm169_vm1, %v6676_v48  ;;  %5046 = vmatprep.mubr.msk.f32.mxu0 %vm169_vm1, %v5967_v14 }
 0x14a   : > { %4850 = vmatmul.mubr.msk.f32.gmra.mrb[26].mxu1 %vm169_vm1, %v6678_v0  ;;  %5047 = vmatmul.mubr.msk.f32.gmra.mrb[24].mxu0 %vm169_vm1, %v5979_v10 }
 0x14b   : > { %4852 = vmatprep.mubr.msk.f32.mxu1 %vm169_vm1, %v6679_v16  ;;  %5049 = vmatprep.mubr.msk.f32.mxu0 %vm169_vm1, %v5983_v5 }
 0x14e   : > { %4853 = vmatmul.mubr.msk.f32.gmra.mrb[28].mxu1 %vm169_vm1, %v6681_v35  ;;  %5050 = vmatmul.mubr.msk.f32.gmra.mrb[26].mxu0 %vm169_vm1, %v6654_v34 }
 0x14f   : > { %4855 = vmatprep.mubr.msk.f32.mxu1 %vm169_vm1, %v6300_v42  ;;  %5052 = vmatprep.mubr.msk.f32.mxu0 %vm169_vm1, %v6683_v53 }
 0x152   : > { %4856 = vmatmul.mubr.msk.f32.gmra.mrb[30].mxu1 %vm169_vm1, %v6310_v51  ;;  %5053 = vmatmul.mubr.msk.f32.gmra.mrb[28].mxu0 %vm169_vm1, %v6684_v59 }
 0x153   : > { %5055 = vmatprep.mubr.msk.f32.mxu0 %vm169_vm1, %v3367_v54 }
 0x156   : > { %5056 = vmatmul.mubr.msk.f32.gmra.mrb[30].mxu0 %vm169_vm1, %v3368_v61 }
 0x1c9   : > { %v4762_v63 = vpop.f32.mrb[0].mxu1 }
 0x1ca   : > { %v1593_v2 = vpop.f32.mrb[1].mxu1 }
 0x1cd   : > { %v4765_v4 = vpop.f32.mrb[2].mxu1 }
 0x1ce   : > { %v1603_v5 = vpop.f32.mrb[3].mxu1 }
 0x1d1   : > { %v4768_v6 = vpop.f32.mrb[4].mxu1 }
 0x1d2   : > { %v1613_v9 = vpop.f32.mrb[5].mxu1 }
 0x1d5   : > { %v4771_v10 = vpop.f32.mrb[6].mxu1 }
 0x1d6   : > { %v1623_v11 = vpop.f32.mrb[7].mxu1 }
 0x1d9   : > { %v4774_v12 = vpop.f32.mrb[8].mxu1 }
 0x1da   : > { %v1633_v13 = vpop.f32.mrb[9].mxu1 }
 0x1dd   : > { %v6444_v14 = vpop.f32.mrb[10].mxu1 }
 0x1de   : > { %v6446_v15 = vpop.f32.mrb[11].mxu1 }
 0x1e1   : > { %v6448_v17 = vpop.f32.mrb[12].mxu1 }
 0x1e2   : > { %v6450_v18 = vpop.f32.mrb[13].mxu1 }
 0x1e5   : > { %v6452_v19 = vpop.f32.mrb[14].mxu1 }
 0x1e6   : > { %v6454_v20 = vpop.f32.mrb[15].mxu1 }
 0x1ed   : > { %v5012_v21 = vpop.f32.mrb[0].mxu0 }
 0x1ee   : > { %v5060_v23 = vadd.f32 %v5012_v21, %v4762_v63  ;;  %v3534_v25 = vpop.f32.mrb[1].mxu0 }
 0x1ef   : > { %v5061_v27 = vadd.f32 %v3534_v25, %v1593_v2 }
 0x1f0   : > { %v3733_v28 = vadd.f32 %v5060_v23, %v6459_v22 }
 0x1f1   : > { %v3732_v29 = vadd.f32 %v5061_v27, %v6459_v22  ;;  %v5015_v30 = vpop.f32.mrb[2].mxu0 }
 0x1f2   : > { %v3765_v31 = vmax.f32 %v3733_v28, 0.0  ;;  %v5062_v38 = vadd.f32 %v5015_v30, %v4765_v4  ;;  %v3544_v39 = vpop.f32.mrb[3].mxu0 }
 0x1f3   : > { %v3764_v40 = vmax.f32 %v3732_v29, 0.0  ;;  %v5063_v44 = vadd.f32 %v3544_v39, %v1603_v5 }
 0x1f4   : > { %3797 = vst [vmem:[#allocation3 + $0x8] sm:$0xff] %v3765_v31  ;;  %v3735_v45 = vadd.f32 %v5062_v38, %v6459_v22 }
 0x1f5   : > { %3796 = vst [vmem:[#allocation3] sm:$0xff] %v3764_v40  ;;  %v3734_v46 = vadd.f32 %v5063_v44, %v6459_v22  ;;  %v5018_v47 = vpop.f32.mrb[4].mxu0 }
 0x1f6   : > { %v3767_v57 = vmax.f32 %v3735_v45, 0.0  ;;  %v5064_v58 = vadd.f32 %v5018_v47, %v4768_v6  ;;  %v3554_v24 = vpop.f32.mrb[5].mxu0 }
 0x1f7   : > { %v3766_v26 = vmax.f32 %v3734_v46, 0.0  ;;  %v5065_v33 = vadd.f32 %v3554_v24, %v1613_v9 }
 0x1f8   : > { %3799 = vst [vmem:[#allocation3 + $0x18] sm:$0xff] %v3767_v57  ;;  %v3737_v56 = vadd.f32 %v5064_v58, %v6459_v22 }
 0x1f9   : > { %3798 = vst [vmem:[#allocation3 + $0x10] sm:$0xff] %v3766_v26  ;;  %v3736_v8 = vadd.f32 %v5065_v33, %v6459_v22  ;;  %v5021_v55 = vpop.f32.mrb[6].mxu0 }
 0x1fa   : > { %v3769_v34 = vmax.f32 %v3737_v56, 0.0  ;;  %v5066_v37 = vadd.f32 %v5021_v55, %v4771_v10  ;;  %v3564_v43 = vpop.f32.mrb[7].mxu0 }
 0x1fb   : > { %v3768_v49 = vmax.f32 %v3736_v8, 0.0  ;;  %v5067_v50 = vadd.f32 %v3564_v43, %v1623_v11 }
 0x1fc   : > { %3801 = vst [vmem:[#allocation3 + $0x28] sm:$0xff] %v3769_v34  ;;  %v3739_v52 = vadd.f32 %v5066_v37, %v6459_v22  ;;  %v3828_v60 = vld [vmem:[#allocation3] ss:$2 sm:$0xff]  ;;  %v3860_v32 = vld [vmem:[#allocation3 + $0x1] ss:$2 sm:$0xff] }
 0x1fd   : > { %3800 = vst [vmem:[#allocation3 + $0x20] sm:$0xff] %v3768_v49  ;;  %v3738_v3 = vadd.f32 %v5067_v50, %v6459_v22  ;;  %v5024_v1 = vpop.f32.mrb[8].mxu0  ;;  %v3891_v7 = vmax.f32 %v3828_v60, %v3860_v32 }
 0x1fe   : > { %v3771_v36 = vmax.f32 %v3739_v52, 0.0  ;;  %v5068_v48 = vadd.f32 %v5024_v1, %v4774_v12  ;;  %v3574_v0 = vpop.f32.mrb[9].mxu0 }
 0x1ff   : > { %v3770_v16 = vmax.f32 %v3738_v3, 0.0  ;;  %v5069_v42 = vadd.f32 %v3574_v0, %v1633_v13 }
 0x200   : > { %v3830_v35 = vld [vmem:[#allocation3 + $0x10] ss:$2 sm:$0xff]  ;;  %v3862_v41 = vld [vmem:[#allocation3 + $0x11] ss:$2 sm:$0xff]  ;;  %3803 = vst [vmem:[#allocation3 + $0x38] sm:$0xff] %v3771_v36  ;;  %v3741_v51 = vadd.f32 %v5068_v48, %v6459_v22 }
 0x201   : > { %v3892_v62 = vmax.f32 %v3830_v35, %v3862_v41  ;;  %3802 = vst [vmem:[#allocation3 + $0x30] sm:$0xff] %v3770_v16  ;;  %v3740_v53 = vadd.f32 %v5069_v42, %v6459_v22  ;;  %v5027_v54 = vpop.f32.mrb[10].mxu0 }
 0x202   : > { %v3773_v59 = vmax.f32 %v3741_v51, 0.0  ;;  %v5070_v61 = vadd.f32 %v5027_v54, %v6444_v14  ;;  %v3584_v63 = vpop.f32.mrb[11].mxu0 }
 0x203   : > { %v3907_v2 = vmax.f32 %v3891_v7, %v3892_v62  ;;  %v3772_v4 = vmax.f32 %v3740_v53, 0.0  ;;  %v5071_v5 = vadd.f32 %v3584_v63, %v6446_v15 }
 0x204   : > { %3805 = vst [vmem:[#allocation3 + $0x48] sm:$0xff] %v3773_v59  ;;  %v3743_v6 = vadd.f32 %v5070_v61, %v6459_v22  ;;  %v3832_v11 = vld [vmem:[#allocation3 + $0x20] ss:$2 sm:$0xff]  ;;  %v3864_v12 = vld [vmem:[#allocation3 + $0x21] ss:$2 sm:$0xff] }
 0x205   : > { %3915 = vst [vmem:[%s6477_s25] sm:$0xff] %v3907_v2  ;;  %3804 = vst [vmem:[#allocation3 + $0x40] sm:$0xff] %v3772_v4  ;;  %v3742_v9 = vadd.f32 %v5071_v5, %v6459_v22  ;;  %v5030_v10 = vpop.f32.mrb[12].mxu0  ;;  %v3893_v29 = vmax.f32 %v3832_v11, %v3864_v12 }
 0x206   : > { %v3775_v13 = vmax.f32 %v3743_v6, 0.0  ;;  %v5072_v14 = vadd.f32 %v5030_v10, %v6448_v17  ;;  %v3594_v21 = vpop.f32.mrb[13].mxu0 }
 0x207   : > { %v3774_v23 = vmax.f32 %v3742_v9, 0.0  ;;  %v5073_v15 = vadd.f32 %v3594_v21, %v6450_v18 }
 0x208   : > { %v3834_v25 = vld [vmem:[#allocation3 + $0x30] ss:$2 sm:$0xff]  ;;  %v3866_v27 = vld [vmem:[#allocation3 + $0x31] ss:$2 sm:$0xff]  ;;  %3807 = vst [vmem:[#allocation3 + $0x58] sm:$0xff] %v3775_v13  ;;  %v3745_v28 = vadd.f32 %v5072_v14, %v6459_v22 }
 0x209   : > { %v3894_v30 = vmax.f32 %v3834_v25, %v3866_v27  ;;  %3806 = vst [vmem:[#allocation3 + $0x50] sm:$0xff] %v3774_v23  ;;  %v3744_v31 = vadd.f32 %v5073_v15, %v6459_v22  ;;  %v4836_v38 = vpop.f32.mrb[16].mxu1  ;;  %v5033_v39 = vpop.f32.mrb[14].mxu0 }
 0x20a   : > { %v3777_v40 = vmax.f32 %v3745_v28, 0.0  ;;  %v5074_v17 = vadd.f32 %v5033_v39, %v6452_v19  ;;  %v2061_v44 = vpop.f32.mrb[17].mxu1  ;;  %v3604_v45 = vpop.f32.mrb[15].mxu0 }
 0x20b   : > { %v3908_v46 = vmax.f32 %v3893_v29, %v3894_v30  ;;  %v3776_v18 = vmax.f32 %v3744_v31, 0.0  ;;  %v5075_v47 = vadd.f32 %v3604_v45, %v6454_v20 }
 0x20c   : > { %3809 = vst [vmem:[#allocation3 + $0x68] sm:$0xff] %v3777_v40  ;;  %v3747_v57 = vadd.f32 %v5074_v17, %v6459_v22  ;;  %v3836_v58 = vld [vmem:[#allocation3 + $0x40] ss:$2 sm:$0xff]  ;;  %v3868_v56 = vld [vmem:[#allocation3 + $0x41] ss:$2 sm:$0xff] }
 0x20d   : > { %3916 = vst [vmem:[%s6477_s25 + $0x8] sm:$0xff] %v3908_v46  ;;  %3808 = vst [vmem:[#allocation3 + $0x60] sm:$0xff] %v3776_v18  ;;  %v3746_v24 = vadd.f32 %v5075_v47, %v6459_v22  ;;  %v4839_v26 = vpop.f32.mrb[18].mxu1  ;;  %v5036_v33 = vpop.f32.mrb[16].mxu0  ;;  %v3895_v52 = vmax.f32 %v3836_v58, %v3868_v56 }
 0x20e   : > { %v3779_v8 = vmax.f32 %v3747_v57, 0.0  ;;  %v5076_v55 = vadd.f32 %v5036_v33, %v4836_v38  ;;  %v2071_v19 = vpop.f32.mrb[19].mxu1  ;;  %v3614_v34 = vpop.f32.mrb[17].mxu0 }
 0x20f   : > { %v3778_v37 = vmax.f32 %v3746_v24, 0.0  ;;  %v5077_v43 = vadd.f32 %v3614_v34, %v2061_v44 }
 0x210   : > { %v3838_v49 = vld [vmem:[#allocation3 + $0x50] ss:$2 sm:$0xff]  ;;  %v3870_v50 = vld [vmem:[#allocation3 + $0x51] ss:$2 sm:$0xff]  ;;  %3811 = vst [vmem:[#allocation3 + $0x78] sm:$0xff] %v3779_v8  ;;  %v3749_v20 = vadd.f32 %v5076_v55, %v6459_v22 }
 0x211   : > { %v3896_v3 = vmax.f32 %v3838_v49, %v3870_v50  ;;  %3810 = vst [vmem:[#allocation3 + $0x70] sm:$0xff] %v3778_v37  ;;  %v3748_v1 = vadd.f32 %v5077_v43, %v6459_v22  ;;  %v4842_v60 = vpop.f32.mrb[20].mxu1  ;;  %v5039_v32 = vpop.f32.mrb[18].mxu0 }
 0x212   : > { %v3781_v36 = vmax.f32 %v3749_v20, 0.0  ;;  %v5078_v48 = vadd.f32 %v5039_v32, %v4839_v26  ;;  %v2081_v0 = vpop.f32.mrb[21].mxu1  ;;  %v3624_v16 = vpop.f32.mrb[19].mxu0 }
 0x213   : > { %v3909_v42 = vmax.f32 %v3895_v52, %v3896_v3  ;;  %v3780_v35 = vmax.f32 %v3748_v1, 0.0  ;;  %v5079_v41 = vadd.f32 %v3624_v16, %v2071_v19 }
 0x214   : > { %3813 = vst [vmem:[#allocation3 + $0x88] sm:$0xff] %v3781_v36  ;;  %v3751_v51 = vadd.f32 %v5078_v48, %v6459_v22  ;;  %v3840_v7 = vld [vmem:[#allocation3 + $0x60] ss:$2 sm:$0xff]  ;;  %v3872_v59 = vld [vmem:[#allocation3 + $0x61] ss:$2 sm:$0xff] }
 0x215   : > { %3917 = vst [vmem:[%s6477_s25 + $0x10] sm:$0xff] %v3909_v42  ;;  %3812 = vst [vmem:[#allocation3 + $0x80] sm:$0xff] %v3780_v35  ;;  %v3750_v62 = vadd.f32 %v5079_v41, %v6459_v22  ;;  %v4845_v53 = vpop.f32.mrb[22].mxu1  ;;  %v5042_v54 = vpop.f32.mrb[20].mxu0  ;;  %v3897_v12 = vmax.f32 %v3840_v7, %v3872_v59 }
 0x216   : > { %v3783_v61 = vmax.f32 %v3751_v51, 0.0  ;;  %v5080_v63 = vadd.f32 %v5042_v54, %v4842_v60  ;;  %v2091_v2 = vpop.f32.mrb[23].mxu1  ;;  %v3634_v4 = vpop.f32.mrb[21].mxu0 }
 0x217   : > { %v3782_v5 = vmax.f32 %v3750_v62, 0.0  ;;  %v5081_v6 = vadd.f32 %v3634_v4, %v2081_v0 }
 0x218   : > { %v3842_v9 = vld [vmem:[#allocation3 + $0x70] ss:$2 sm:$0xff]  ;;  %v3874_v10 = vld [vmem:[#allocation3 + $0x71] ss:$2 sm:$0xff]  ;;  %3815 = vst [vmem:[#allocation3 + $0x98] sm:$0xff] %v3783_v61  ;;  %v3753_v11 = vadd.f32 %v5080_v63, %v6459_v22 }
 0x219   : > { %v3898_v13 = vmax.f32 %v3842_v9, %v3874_v10  ;;  %3814 = vst [vmem:[#allocation3 + $0x90] sm:$0xff] %v3782_v5  ;;  %v3752_v14 = vadd.f32 %v5081_v6, %v6459_v22  ;;  %v4848_v21 = vpop.f32.mrb[24].mxu1  ;;  %v5045_v23 = vpop.f32.mrb[22].mxu0 }
 0x21a   : > { %v3785_v15 = vmax.f32 %v3753_v11, 0.0  ;;  %v5082_v25 = vadd.f32 %v5045_v23, %v4845_v53  ;;  %v2101_v27 = vpop.f32.mrb[25].mxu1  ;;  %v3644_v28 = vpop.f32.mrb[23].mxu0 }
 0x21b   : > { %v3910_v29 = vmax.f32 %v3897_v12, %v3898_v13  ;;  %v3784_v30 = vmax.f32 %v3752_v14, 0.0  ;;  %v5083_v31 = vadd.f32 %v3644_v28, %v2091_v2 }
 0x21c   : > { %3817 = vst [vmem:[#allocation3 + $0xa8] sm:$0xff] %v3785_v15  ;;  %v3755_v38 = vadd.f32 %v5082_v25, %v6459_v22  ;;  %v3844_v39 = vld [vmem:[#allocation3 + $0x80] ss:$2 sm:$0xff]  ;;  %v3876_v45 = vld [vmem:[#allocation3 + $0x81] ss:$2 sm:$0xff] }
 0x21d   : > { %3918 = vst [vmem:[%s6477_s25 + $0x18] sm:$0xff] %v3910_v29  ;;  %3816 = vst [vmem:[#allocation3 + $0xa0] sm:$0xff] %v3784_v30  ;;  %v3754_v40 = vadd.f32 %v5083_v31, %v6459_v22  ;;  %v4851_v17 = vpop.f32.mrb[26].mxu1  ;;  %v5048_v44 = vpop.f32.mrb[24].mxu0  ;;  %v3899_v8 = vmax.f32 %v3844_v39, %v3876_v45 }
 0x21e   : > { %v3787_v46 = vmax.f32 %v3755_v38, 0.0  ;;  %v5084_v18 = vadd.f32 %v5048_v44, %v4848_v21  ;;  %v2111_v47 = vpop.f32.mrb[27].mxu1  ;;  %v3654_v57 = vpop.f32.mrb[25].mxu0 }
 0x21f   : > { %v3786_v58 = vmax.f32 %v3754_v40, 0.0  ;;  %v5085_v24 = vadd.f32 %v3654_v57, %v2101_v27 }
 0x220   : > { %v3846_v26 = vld [vmem:[#allocation3 + $0x90] ss:$2 sm:$0xff]  ;;  %v3878_v33 = vld [vmem:[#allocation3 + $0x91] ss:$2 sm:$0xff]  ;;  %3819 = vst [vmem:[#allocation3 + $0xb8] sm:$0xff] %v3787_v46  ;;  %v3757_v56 = vadd.f32 %v5084_v18, %v6459_v22 }
 0x221   : > { %v3900_v55 = vmax.f32 %v3846_v26, %v3878_v33  ;;  %3818 = vst [vmem:[#allocation3 + $0xb0] sm:$0xff] %v3786_v58  ;;  %v3756_v19 = vadd.f32 %v5085_v24, %v6459_v22  ;;  %v4854_v34 = vpop.f32.mrb[28].mxu1  ;;  %v5051_v37 = vpop.f32.mrb[26].mxu0 }
 0x222   : > { %v3789_v43 = vmax.f32 %v3757_v56, 0.0  ;;  %v5086_v49 = vadd.f32 %v5051_v37, %v4851_v17  ;;  %v2121_v50 = vpop.f32.mrb[29].mxu1  ;;  %v3664_v20 = vpop.f32.mrb[27].mxu0 }
 0x223   : > { %v3911_v52 = vmax.f32 %v3899_v8, %v3900_v55  ;;  %v3788_v3 = vmax.f32 %v3756_v19, 0.0  ;;  %v5087_v1 = vadd.f32 %v3664_v20, %v2111_v47 }
 0x224   : > { %3821 = vst [vmem:[#allocation3 + $0xc8] sm:$0xff] %v3789_v43  ;;  %v3759_v60 = vadd.f32 %v5086_v49, %v6459_v22  ;;  %v3848_v32 = vld [vmem:[#allocation3 + $0xa0] ss:$2 sm:$0xff]  ;;  %v3880_v16 = vld [vmem:[#allocation3 + $0xa1] ss:$2 sm:$0xff] }
 0x225   : > { %3919 = vst [vmem:[%s6477_s25 + $0x20] sm:$0xff] %v3911_v52  ;;  %3820 = vst [vmem:[#allocation3 + $0xc0] sm:$0xff] %v3788_v3  ;;  %v3758_v36 = vadd.f32 %v5087_v1, %v6459_v22  ;;  %v4857_v48 = vpop.f32.mrb[30].mxu1  ;;  %v5054_v0 = vpop.f32.mrb[28].mxu0  ;;  %v3901_v61 = vmax.f32 %v3848_v32, %v3880_v16 }
 0x226   : > { %v3791_v42 = vmax.f32 %v3759_v60, 0.0  ;;  %v5088_v35 = vadd.f32 %v5054_v0, %v4854_v34  ;;  %v2131_v41 = vpop.f32.mrb[31].mxu1  ;;  %v3674_v51 = vpop.f32.mrb[29].mxu0 }
 0x227   : > { %v3790_v7 = vmax.f32 %v3758_v36, 0.0  ;;  %v5089_v62 = vadd.f32 %v3674_v51, %v2121_v50 }
 0x228   : > { %v3850_v53 = vld [vmem:[#allocation3 + $0xb0] ss:$2 sm:$0xff]  ;;  %v3882_v54 = vld [vmem:[#allocation3 + $0xb1] ss:$2 sm:$0xff]  ;;  %3823 = vst [vmem:[#allocation3 + $0xd8] sm:$0xff] %v3791_v42  ;;  %v3761_v59 = vadd.f32 %v5088_v35, %v6459_v22 }
 0x229   : > { %v3902_v63 = vmax.f32 %v3850_v53, %v3882_v54  ;;  %3822 = vst [vmem:[#allocation3 + $0xd0] sm:$0xff] %v3790_v7  ;;  %v3760_v2 = vadd.f32 %v5089_v62, %v6459_v22  ;;  %v5057_v4 = vpop.f32.mrb[30].mxu0 }
 0x22a   : > { %v3793_v5 = vmax.f32 %v3761_v59, 0.0  ;;  %v5090_v6 = vadd.f32 %v5057_v4, %v4857_v48  ;;  %v3684_v9 = vpop.f32.mrb[31].mxu0 }
 0x22b   : > { %v3912_v10 = vmax.f32 %v3901_v61, %v3902_v63  ;;  %v3792_v11 = vmax.f32 %v3760_v2, 0.0  ;;  %v5091_v12 = vadd.f32 %v3684_v9, %v2131_v41 }
 0x22c   : > { %3825 = vst [vmem:[#allocation3 + $0xe8] sm:$0xff] %v3793_v5  ;;  %v3763_v13 = vadd.f32 %v5090_v6, %v6459_v22  ;;  %v3852_v21 = vld [vmem:[#allocation3 + $0xc0] ss:$2 sm:$0xff]  ;;  %v3884_v23 = vld [vmem:[#allocation3 + $0xc1] ss:$2 sm:$0xff] }
 0x22d   : > { %3920 = vst [vmem:[%s6477_s25 + $0x28] sm:$0xff] %v3912_v10  ;;  %3824 = vst [vmem:[#allocation3 + $0xe0] sm:$0xff] %v3792_v11  ;;  %v3762_v14 = vadd.f32 %v5091_v12, %v6459_v22  ;;  %v3903_v29 = vmax.f32 %v3852_v21, %v3884_v23 }
 0x22e   : > { %v3795_v15 = vmax.f32 %v3763_v13, 0.0 }
 0x22f   : > { %v3794_v25 = vmax.f32 %v3762_v14, 0.0 }
 0x230   : > { %v3854_v27 = vld [vmem:[#allocation3 + $0xd0] ss:$2 sm:$0xff]  ;;  %v3886_v28 = vld [vmem:[#allocation3 + $0xd1] ss:$2 sm:$0xff]  ;;  %3827 = vst [vmem:[#allocation3 + $0xf8] sm:$0xff] %v3795_v15 }
 0x231   : > { %v3904_v30 = vmax.f32 %v3854_v27, %v3886_v28  ;;  %3826 = vst [vmem:[#allocation3 + $0xf0] sm:$0xff] %v3794_v25 }
 0x233   : > { %v3913_v31 = vmax.f32 %v3903_v29, %v3904_v30 }
 0x234   : > { %v3856_v38 = vld [vmem:[#allocation3 + $0xe0] ss:$2 sm:$0xff]  ;;  %v3888_v39 = vld [vmem:[#allocation3 + $0xe1] ss:$2 sm:$0xff] }
 0x235   : > { %3921 = vst [vmem:[%s6477_s25 + $0x30] sm:$0xff] %v3913_v31  ;;  %v3905_v17 = vmax.f32 %v3856_v38, %v3888_v39 }
 0x238   : > { %v3858_v22 = vld [vmem:[#allocation3 + $0xf0] ss:$2 sm:$0xff]  ;;  %v3890_v40 = vld [vmem:[#allocation3 + $0xf1] ss:$2 sm:$0xff] }
 0x239   : > { %v3906_v44 = vmax.f32 %v3858_v22, %v3890_v40 }
 0x23b   : > { %v3914_v45 = vmax.f32 %v3905_v17, %v3906_v44 }
 0x23d   : > { %3922 = vst [vmem:[%s6477_s25 + $0x38] sm:$0xff] %v3914_v45 }
 0x23e   : > { %5371 = shalt.err (!%p5368_p3)
}
 0x23f   : > { %s5372_s8 = scalar_lea.hbm %s6516_s30, 1024  ;;  %s5376_s11 = scalar_lea.hbm %s6567_s3, 2048 }
 0x240   : > { %p5373_p4 = scmp.ne.s32.totalorder %s6516_s30, %s5372_s8  ;;  %p5377_p9 = scmp.lt.u32.totalorder %s6516_s30, %s6567_s3 }
 0x241   : > { %p5378_p10 = scmp.lt.u32.totalorder %s5376_s11, %s5372_s8  ;;  %p5380_p12 = scmp.lt.u32.totalorder %s5372_s8, %s6516_s30 }
 0x242   : > { %p5374_p7 = pnand %p5373_p4, %p5484_p5 }
 0x243   : > { %p5379_p11 = por %p5378_p10, %p5377_p9 }
 0x244   : > { %p5375_p8 = pneg %p5374_p7 }
 0x245   : > { %p5381_p13 = por %p5380_p12, %p5379_p11 }
 0x247   : > { %p5382_p0 = pnand %p5381_p13, %p5375_p8 }
 0x249   : > { %5385 = shalt.err (!%p5382_p0)
}
 0x24a   : > { %s5424_s20 = smov 128   ;;  %s5425_s24 = smov 8  }
 0x24b   : > { %5316 = dma.vmem_to_hbm [thread:$0]  (%p5484_p5), %s6518_s27, 1024, %s6516_s30, %s6523_s4, %s5424_s20, %s5424_s20, %s5425_s24  }
 0x24c PF: > { %p5322_p1 = scmp.ge.s32.totalorder %s5420_s15, 2  ;;  %s3952_s25 = sand.u32 1, %s5408_s12  }
 0x24d   : > { %s3953_s26 = scalar_lea.sflag [#allocation5], %s3952_s25 }
 0x24e   : > { %p5319_p2 = pnand %p5322_p1, %p5488_p6 }
 0x250   : > { %5403 = dma.done.wait (!%p5319_p2), %s3953_s26, 1024  }
 0x251   : > { %5405 = vsyncadd (!%p5319_p2), %s3953_s26, 4294966272  ;;  %p13_p3 = scmp.ge.s32.totalorder %s5471_s18, 4   ;;  %s6685_s12 = smov %s5412_s13 }
 0x252   : > { %s6686_s13 = smov %s5416_s14  ;;  %s6687_s14 = smov %s5482_s21 }
 0x253   : > { %s6688_s15 = smov %s5471_s18  ;;  %15 = sbr.rel (!%p13_p3) target bundleno = 3 (0x3), region = 100 }
 0x25a   :  { %3958 = vsyncpa [#allocation5], 1 }
 0x25b   :  { %3960 = vsyncpa [#allocation5 + $0x1], 1 }

</bundles_post_ra>
